<compile_context>
chip_gen: v7x
topology: tpu7x:2x2x1
jax: 0.10.0
libtpu: 0.0.40
codegen_flags: <defaults>
</compile_context>

<pallas_src>
import math

import jax
import jax.numpy as jnp
from jax.experimental import pallas as pl
from jax.experimental.pallas import tpu as pltpu

HIDDEN_SIZES = (100, 128, 256, 512, 1024)  # fc0..fc4 output dims
LANE = 128
SUBLANE = 8


def _round_up(x, m):
    return ((x + m - 1) // m) * m


def _cdiv(a, b):
    return -(-a // b)


def _point_decoder_kernel(
    x_ref,
    w0_ref, b0_ref,
    w1_ref, b1_ref,
    w2_ref, b2_ref,
    w3_ref, b3_ref,
    w4_ref, b4_ref,
    w5_ref, b5_ref,
    out_ref,
    h_ref,
):
    """One (batch-tile i, output-tile j) grid step.

    The hidden chain fc0..fc4 is computed once per batch tile (j == 0) into a
    bf16 VMEM scratch; every j step then runs the fc5 matmul for its output
    column tile.  NOTE: the scratch reuse relies on j being the LAST grid axis
    and marked "arbitrary" (never sharded across TensorCores) -- do not change
    the grid order / semantics without also changing the j == 0 guard.
    """
    j = pl.program_id(1)

    @pl.when(j == 0)
    def _():
        def linear_relu(h, w_ref, b_ref):
            y = jnp.dot(h.astype(w_ref.dtype), w_ref[...],
                        preferred_element_type=jnp.float32)
            return jnp.maximum(y + b_ref[...], 0.0)

        h = x_ref[...].astype(jnp.float32)
        h = linear_relu(h, w0_ref, b0_ref)   # (TB, 128)
        h = linear_relu(h, w1_ref, b1_ref)   # (TB, 128)
        h = linear_relu(h, w2_ref, b2_ref)   # (TB, 256)
        h = linear_relu(h, w3_ref, b3_ref)   # (TB, 512)
        h = linear_relu(h, w4_ref, b4_ref)   # (TB, 1024)
        h_ref[...] = h.astype(h_ref.dtype)   # bf16 scratch (reference casts too)

    # fc5 tile: bf16 x bf16 -> f32 accumulate, bias + tanh in f32.
    y = jnp.dot(h_ref[...], w5_ref[...],
                preferred_element_type=jnp.float32) + b5_ref[...]
    out_ref[...] = jnp.tanh(y)               # (TB, TN), f32


def init_point_decoder_params(key, num_points, latent_size, dtype=jnp.float32):
    """PyTorch-default-like init: U(-1/sqrt(fan_in), 1/sqrt(fan_in))."""
    sizes = [latent_size, *HIDDEN_SIZES, num_points * 3]
    params = []
    for i in range(6):
        fan_in, fan_out = sizes[i], sizes[i + 1]
        bound = 1.0 / math.sqrt(fan_in)
        key, kw, kb = jax.random.split(key, 3)
        w = jax.random.uniform(kw, (fan_in, fan_out), dtype, -bound, bound)
        b = jax.random.uniform(kb, (1, fan_out), dtype, -bound, bound)
        params.append((w, b))
    return params


def prepare_point_decoder_params(params, latent_size, num_points,
                                 matmul_dtype=jnp.bfloat16):
    """Zero-pad all dims to multiples of 128 and cast weights to the MXU dtype.

    Zero padding is numerically inert: padded hidden units see zero weights and
    zero bias -> ReLU(0) = 0 -> contribute nothing downstream; padded output
    columns give tanh(0) and are sliced off.
    """
    sizes = [latent_size, *HIDDEN_SIZES, num_points * 3]
    padded_sizes = [_round_up(s, LANE) for s in sizes]
    padded = []
    for (w, b), k_in, k_out, p_in, p_out in zip(
            params, sizes[:-1], sizes[1:], padded_sizes[:-1], padded_sizes[1:]):
        wp = jnp.zeros((p_in, p_out), matmul_dtype).at[:k_in, :k_out].set(
            w.astype(matmul_dtype))
        bp = jnp.zeros((1, p_out), jnp.float32).at[:, :k_out].set(
            b.astype(jnp.float32))
        padded.append((wp, bp))
    return padded, padded_sizes


def _estimate_vmem_bytes(tb, k0p, tn, padded_params):
    """Conservative VMEM working-set estimate (counts everything double-buffered)."""
    total = 2 * tb * k0p * 4                                    # x tile (f32)
    for w, b in padded_params[:-1]:                             # fc0..fc4 resident
        total += 2 * (w.size * w.dtype.itemsize + b.size * b.dtype.itemsize)
    w5, b5 = padded_params[-1]
    total += 2 * (w5.shape[0] * tn * w5.dtype.itemsize + tn * b5.dtype.itemsize)
    total += 2 * tb * tn * 4                                    # out tile (f32)
    total += tb * HIDDEN_SIZES[-1] * 2                          # bf16 hidden scratch
    return total


def point_decoder_forward(x, padded_params, padded_sizes, num_points,
                          *, batch_tile=256, n_tile=1024,
                          resident_w5_bytes=12 << 20, min_batch_tiles=None):
    """x: (batch, latent_size) f32 -> (batch, num_points, 3) f32.

    batch_tile        : primary tuning knob (256 default; v6e can use 512).
    n_tile            : fc5 output-column tile when w5 is streamed (mult. of 128).
    resident_w5_bytes : keep the whole fc5 weight resident in VMEM (fetched
                        once, never re-streamed per batch tile) when it fits.
    min_batch_tiles   : force >= this many batch tiles (v7x has 2 TensorCores
                        and only the batch axis is "parallel").  Defaults to 2
                        when w5 is resident (extra tiles then cost no extra
                        HBM traffic), else 1.
    """
    batch, latent = x.shape
    k0p = padded_sizes[0]
    n_out = num_points * 3
    n_lane = padded_sizes[-1]                       # round_up(num_points*3, 128)
    w5, b5 = padded_params[-1]

    # --- fc5 output-column tiling: resident whole weight if it fits, else
    # stream big fixed tiles (pad n UP to a multiple of tn, never shrink tn).
    w5_bytes = w5.shape[0] * n_lane * jnp.dtype(w5.dtype).itemsize
    w5_resident = w5_bytes <= resident_w5_bytes
    if w5_resident:
        tn = n_lane
        n_pad = n_lane
    else:
        tn = min(n_tile, n_lane)
        n_pad = _round_up(n_lane, tn)
    if n_pad > n_lane:
        w5 = jnp.pad(w5, ((0, 0), (0, n_pad - n_lane)))
        b5 = jnp.pad(b5, ((0, 0), (0, n_pad - n_lane)))

    # --- balanced batch tiling (8-row aligned); >=2 tiles for v7x when free.
    b_min = _round_up(batch, SUBLANE)
    if min_batch_tiles is None:
        min_batch_tiles = 2 if w5_resident else 1
    nbt = _cdiv(b_min, batch_tile)
    nbt = max(nbt, min(min_batch_tiles, b_min // SUBLANE))
    tb = _round_up(_cdiv(b_min, nbt), SUBLANE)
    b_pad = nbt * tb

    x_pad = jnp.zeros((b_pad, k0p), jnp.float32).at[:batch, :latent].set(
        x.astype(jnp.float32))

    grid = (nbt, n_pad // tn)

    def const_map(i, j):
        return (0, 0)

    in_specs = [pl.BlockSpec((tb, k0p), lambda i, j: (i, 0))]   # x tile
    flat_args = [x_pad]
    # fc0..fc4 weights/biases: whole arrays, constant block index -> resident.
    for (w, b) in padded_params[:-1]:
        flat_args.extend([w, b])
        in_specs.append(pl.BlockSpec(w.shape, const_map))
        in_specs.append(pl.BlockSpec(b.shape, const_map))
    # fc5 weight/bias: constant block index when resident (j grid == 1),
    # otherwise streamed along the output-column axis j.
    flat_args.extend([w5, b5])
    in_specs.append(pl.BlockSpec((w5.shape[0], tn), lambda i, j: (0, j)))
    in_specs.append(pl.BlockSpec((1, tn), lambda i, j: (0, j)))

    vmem_limit = int(min(
        max(_estimate_vmem_bytes(tb, k0p, tn, padded_params) * 5 // 4 + (4 << 20),
            32 << 20),
        64 << 20))

    out = pl.pallas_call(
        _point_decoder_kernel,
        out_shape=jax.ShapeDtypeStruct((b_pad, n_pad), jnp.float32),
        grid_spec=pltpu.PrefetchScalarGridSpec(
            num_scalar_prefetch=0,
            grid=grid,
            in_specs=in_specs,
            out_specs=pl.BlockSpec((tb, tn), lambda i, j: (i, j)),
            scratch_shapes=[pltpu.VMEM((tb, HIDDEN_SIZES[-1]), jnp.bfloat16)],
        ),
        compiler_params=pltpu.CompilerParams(
            dimension_semantics=("parallel", "arbitrary"),
            vmem_limit_bytes=vmem_limit),
    )(*flat_args)

    return out[:batch, :n_out].reshape(batch, num_points, 3)


def _reference_forward(x, params, matmul_dtype=jnp.bfloat16):
    """Pure-JAX reference matching the kernel's numerics (bf16 matmuls, f32 acc)."""
    h = x.astype(jnp.float32)
    for (w, b) in params[:-1]:
        y = jnp.dot(h.astype(matmul_dtype), w.astype(matmul_dtype),
                    preferred_element_type=jnp.float32) + b
        h = jnp.maximum(y, 0.0)
    w, b = params[-1]
    y = jnp.dot(h.astype(matmul_dtype), w.astype(matmul_dtype),
                preferred_element_type=jnp.float32) + b
    return jnp.tanh(y)


if __name__ == "__main__":
    num_points = 8
    latent_size = 32
    batch = 2

    key = jax.random.PRNGKey(0)
    key, kx = jax.random.split(key)
    x = jax.random.normal(kx, (batch, latent_size), jnp.float32)

    params = init_point_decoder_params(key, num_points, latent_size)
    padded_params, padded_sizes = prepare_point_decoder_params(
        params, latent_size, num_points)

    out = point_decoder_forward(x, padded_params, padded_sizes, num_points)
    out = jax.block_until_ready(out)

    ref = _reference_forward(x, params).reshape(batch, num_points, 3)
    assert out.shape == (batch, num_points, 3)
    assert jnp.allclose(out, ref, atol=1e-2, rtol=1e-2), float(
        jnp.max(jnp.abs(out - ref)))

    print("KERNEL_OK")
</pallas_src>

<mosaic_0001>
module attributes {stable_mosaic.version = 11 : i64} {
  func.func @_point_decoder_kernel(%arg0: i32, %arg1: i32, %arg2: memref<8x128xf32, #tpu.memory_space<vmem>>, %arg3: memref<128x128xbf16, #tpu.memory_space<vmem>>, %arg4: memref<1x128xf32, #tpu.memory_space<vmem>>, %arg5: memref<128x128xbf16, #tpu.memory_space<vmem>>, %arg6: memref<1x128xf32, #tpu.memory_space<vmem>>, %arg7: memref<128x256xbf16, #tpu.memory_space<vmem>>, %arg8: memref<1x256xf32, #tpu.memory_space<vmem>>, %arg9: memref<256x512xbf16, #tpu.memory_space<vmem>>, %arg10: memref<1x512xf32, #tpu.memory_space<vmem>>, %arg11: memref<512x1024xbf16, #tpu.memory_space<vmem>>, %arg12: memref<1x1024xf32, #tpu.memory_space<vmem>>, %arg13: memref<1024x128xbf16, #tpu.memory_space<vmem>>, %arg14: memref<1x128xf32, #tpu.memory_space<vmem>>, %arg15: memref<8x128xf32, #tpu.memory_space<vmem>>, %arg16: memref<8x1024xbf16, #tpu.memory_space<vmem>>) attributes {dimension_semantics = [#tpu.dimension_semantics<parallel>, #tpu.dimension_semantics<arbitrary>], iteration_bounds = array<i64: 1, 1>, scalar_prefetch = 0 : i64, scratch_operands = 1 : i64, tpu.core_type = #tpu.core_type<tc>, window_params = [{transform_indices = @transform_0, window_bounds = array<i64: 8, 128>}, {pipeline_mode = #tpu.pipeline_mode<synchronous>, transform_indices = @transform_1, window_bounds = array<i64: 128, 128>}, {pipeline_mode = #tpu.pipeline_mode<synchronous>, transform_indices = @transform_2, window_bounds = array<i64: 1, 128>}, {pipeline_mode = #tpu.pipeline_mode<synchronous>, transform_indices = @transform_3, window_bounds = array<i64: 128, 128>}, {pipeline_mode = #tpu.pipeline_mode<synchronous>, transform_indices = @transform_4, window_bounds = array<i64: 1, 128>}, {pipeline_mode = #tpu.pipeline_mode<synchronous>, transform_indices = @transform_5, window_bounds = array<i64: 128, 256>}, {pipeline_mode = #tpu.pipeline_mode<synchronous>, transform_indices = @transform_6, window_bounds = array<i64: 1, 256>}, {pipeline_mode = #tpu.pipeline_mode<synchronous>, transform_indices = @transform_7, window_bounds = array<i64: 256, 512>}, {pipeline_mode = #tpu.pipeline_mode<synchronous>, transform_indices = @transform_8, window_bounds = array<i64: 1, 512>}, {pipeline_mode = #tpu.pipeline_mode<synchronous>, transform_indices = @transform_9, window_bounds = array<i64: 512, 1024>}, {pipeline_mode = #tpu.pipeline_mode<synchronous>, transform_indices = @transform_10, window_bounds = array<i64: 1, 1024>}, {transform_indices = @transform_11, window_bounds = array<i64: 1024, 128>}, {transform_indices = @transform_12, window_bounds = array<i64: 1, 128>}, {transform_indices = @transform_13, window_bounds = array<i64: 8, 128>}]} {
    %c0_i32 = arith.constant 0 : i32
    %0 = arith.cmpi eq, %arg1, %c0_i32 : i32
    %1 = arith.extui %0 : i1 to i32
    %c0_i32_0 = arith.constant 0 : i32
    %2 = arith.cmpi ne, %1, %c0_i32_0 : i32
    scf.if %2 {
      %c0_8 = arith.constant 0 : index
      %c0_9 = arith.constant 0 : index
      %11 = vector.load %arg2[%c0_8, %c0_9] : memref<8x128xf32, #tpu.memory_space<vmem>>, vector<8x128xf32>
      %12 = arith.truncf %11 : vector<8x128xf32> to vector<8x128xbf16>
      %c0_10 = arith.constant 0 : index
      %c0_11 = arith.constant 0 : index
      %13 = vector.load %arg3[%c0_10, %c0_11] : memref<128x128xbf16, #tpu.memory_space<vmem>>, vector<128x128xbf16>
      %cst_12 = arith.constant dense<0.000000e+00> : vector<8x128xf32>
      %14 = tpu.matmul %12, %13, %cst_12 {dimension_numbers = #tpu.dot_dimension_numbers<[1], [0], [0], [1], [0, 0, 1, 1], [], []>} : vector<8x128xbf16>, vector<128x128xbf16>, vector<8x128xf32> -> vector<8x128xf32>
      %c0_13 = arith.constant 0 : index
      %c0_14 = arith.constant 0 : index
      %15 = vector.load %arg4[%c0_13, %c0_14] : memref<1x128xf32, #tpu.memory_space<vmem>>, vector<1x128xf32>
      %16 = vector.broadcast %15 : vector<1x128xf32> to vector<8x128xf32>
      %17 = arith.addf %14, %16 : vector<8x128xf32>
      %cst_15 = arith.constant 0.000000e+00 : f32
      %18 = vector.broadcast %cst_15 : f32 to vector<8x128xf32>
      %19 = arith.maximumf %17, %18 : vector<8x128xf32>
      %20 = arith.truncf %19 : vector<8x128xf32> to vector<8x128xbf16>
      %c0_16 = arith.constant 0 : index
      %c0_17 = arith.constant 0 : index
      %21 = vector.load %arg5[%c0_16, %c0_17] : memref<128x128xbf16, #tpu.memory_space<vmem>>, vector<128x128xbf16>
      %cst_18 = arith.constant dense<0.000000e+00> : vector<8x128xf32>
      %22 = tpu.matmul %20, %21, %cst_18 {dimension_numbers = #tpu.dot_dimension_numbers<[1], [0], [0], [1], [0, 0, 1, 1], [], []>} : vector<8x128xbf16>, vector<128x128xbf16>, vector<8x128xf32> -> vector<8x128xf32>
      %c0_19 = arith.constant 0 : index
      %c0_20 = arith.constant 0 : index
      %23 = vector.load %arg6[%c0_19, %c0_20] : memref<1x128xf32, #tpu.memory_space<vmem>>, vector<1x128xf32>
      %24 = vector.broadcast %23 : vector<1x128xf32> to vector<8x128xf32>
      %25 = arith.addf %22, %24 : vector<8x128xf32>
      %cst_21 = arith.constant 0.000000e+00 : f32
      %26 = vector.broadcast %cst_21 : f32 to vector<8x128xf32>
      %27 = arith.maximumf %25, %26 : vector<8x128xf32>
      %28 = arith.truncf %27 : vector<8x128xf32> to vector<8x128xbf16>
      %c0_22 = arith.constant 0 : index
      %c0_23 = arith.constant 0 : index
      %29 = vector.load %arg7[%c0_22, %c0_23] : memref<128x256xbf16, #tpu.memory_space<vmem>>, vector<128x256xbf16>
      %cst_24 = arith.constant dense<0.000000e+00> : vector<8x256xf32>
      %30 = tpu.matmul %28, %29, %cst_24 {dimension_numbers = #tpu.dot_dimension_numbers<[1], [0], [0], [1], [0, 0, 1, 1], [], []>} : vector<8x128xbf16>, vector<128x256xbf16>, vector<8x256xf32> -> vector<8x256xf32>
      %c0_25 = arith.constant 0 : index
      %c0_26 = arith.constant 0 : index
      %31 = vector.load %arg8[%c0_25, %c0_26] : memref<1x256xf32, #tpu.memory_space<vmem>>, vector<1x256xf32>
      %32 = vector.broadcast %31 : vector<1x256xf32> to vector<8x256xf32>
      %33 = arith.addf %30, %32 : vector<8x256xf32>
      %cst_27 = arith.constant 0.000000e+00 : f32
      %34 = vector.broadcast %cst_27 : f32 to vector<8x256xf32>
      %35 = arith.maximumf %33, %34 : vector<8x256xf32>
      %36 = arith.truncf %35 : vector<8x256xf32> to vector<8x256xbf16>
      %c0_28 = arith.constant 0 : index
      %c0_29 = arith.constant 0 : index
      %37 = vector.load %arg9[%c0_28, %c0_29] : memref<256x512xbf16, #tpu.memory_space<vmem>>, vector<256x512xbf16>
      %cst_30 = arith.constant dense<0.000000e+00> : vector<8x512xf32>
      %38 = tpu.matmul %36, %37, %cst_30 {dimension_numbers = #tpu.dot_dimension_numbers<[1], [0], [0], [1], [0, 0, 1, 1], [], []>} : vector<8x256xbf16>, vector<256x512xbf16>, vector<8x512xf32> -> vector<8x512xf32>
      %c0_31 = arith.constant 0 : index
      %c0_32 = arith.constant 0 : index
      %39 = vector.load %arg10[%c0_31, %c0_32] : memref<1x512xf32, #tpu.memory_space<vmem>>, vector<1x512xf32>
      %40 = vector.broadcast %39 : vector<1x512xf32> to vector<8x512xf32>
      %41 = arith.addf %38, %40 : vector<8x512xf32>
      %cst_33 = arith.constant 0.000000e+00 : f32
      %42 = vector.broadcast %cst_33 : f32 to vector<8x512xf32>
      %43 = arith.maximumf %41, %42 : vector<8x512xf32>
      %44 = arith.truncf %43 : vector<8x512xf32> to vector<8x512xbf16>
      %c0_34 = arith.constant 0 : index
      %c0_35 = arith.constant 0 : index
      %45 = vector.load %arg11[%c0_34, %c0_35] : memref<512x1024xbf16, #tpu.memory_space<vmem>>, vector<512x1024xbf16>
      %cst_36 = arith.constant dense<0.000000e+00> : vector<8x1024xf32>
      %46 = tpu.matmul %44, %45, %cst_36 {dimension_numbers = #tpu.dot_dimension_numbers<[1], [0], [0], [1], [0, 0, 1, 1], [], []>} : vector<8x512xbf16>, vector<512x1024xbf16>, vector<8x1024xf32> -> vector<8x1024xf32>
      %c0_37 = arith.constant 0 : index
      %c0_38 = arith.constant 0 : index
      %47 = vector.load %arg12[%c0_37, %c0_38] : memref<1x1024xf32, #tpu.memory_space<vmem>>, vector<1x1024xf32>
      %48 = vector.broadcast %47 : vector<1x1024xf32> to vector<8x1024xf32>
      %49 = arith.addf %46, %48 : vector<8x1024xf32>
      %cst_39 = arith.constant 0.000000e+00 : f32
      %50 = vector.broadcast %cst_39 : f32 to vector<8x1024xf32>
      %51 = arith.maximumf %49, %50 : vector<8x1024xf32>
      %52 = arith.truncf %51 : vector<8x1024xf32> to vector<8x1024xbf16>
      %c0_40 = arith.constant 0 : index
      %c0_41 = arith.constant 0 : index
      %53 = vector.load %arg16[%c0_40, %c0_41] : memref<8x1024xbf16, #tpu.memory_space<vmem>>, vector<8x1024xbf16>
      tpu.vector_store %arg16[%c0_40, %c0_41], %52 {strides = array<i32>} : memref<8x1024xbf16, #tpu.memory_space<vmem>>, vector<8x1024xbf16>,
    } else {
    }
    %c0 = arith.constant 0 : index
    %c0_1 = arith.constant 0 : index
    %3 = vector.load %arg16[%c0, %c0_1] : memref<8x1024xbf16, #tpu.memory_space<vmem>>, vector<8x1024xbf16>
    %c0_2 = arith.constant 0 : index
    %c0_3 = arith.constant 0 : index
    %4 = vector.load %arg13[%c0_2, %c0_3] : memref<1024x128xbf16, #tpu.memory_space<vmem>>, vector<1024x128xbf16>
    %cst = arith.constant dense<0.000000e+00> : vector<8x128xf32>
    %5 = tpu.matmul %3, %4, %cst {dimension_numbers = #tpu.dot_dimension_numbers<[1], [0], [0], [1], [0, 0, 1, 1], [], []>} : vector<8x1024xbf16>, vector<1024x128xbf16>, vector<8x128xf32> -> vector<8x128xf32>
    %c0_4 = arith.constant 0 : index
    %c0_5 = arith.constant 0 : index
    %6 = vector.load %arg14[%c0_4, %c0_5] : memref<1x128xf32, #tpu.memory_space<vmem>>, vector<1x128xf32>
    %7 = vector.broadcast %6 : vector<1x128xf32> to vector<8x128xf32>
    %8 = arith.addf %5, %7 : vector<8x128xf32>
    %9 = math.tanh %8 : vector<8x128xf32>
    %c0_6 = arith.constant 0 : index
    %c0_7 = arith.constant 0 : index
    %10 = vector.load %arg15[%c0_6, %c0_7] : memref<8x128xf32, #tpu.memory_space<vmem>>, vector<8x128xf32>
    tpu.vector_store %arg15[%c0_6, %c0_7], %9 {strides = array<i32>} : memref<8x128xf32, #tpu.memory_space<vmem>>, vector<8x128xf32>,
    return
  }
  func.func @transform_0(%arg0: i32, %arg1: i32) -> (i32, i32) {
    %c0_i32 = arith.constant 0 : i32
    %c0_i32_0 = arith.constant 0 : i32
    return %arg0, %c0_i32 : i32, i32
  }
  func.func @transform_1(%arg0: i32, %arg1: i32) -> (i32, i32) {
    %c0_i32 = arith.constant 0 : i32
    %c0_i32_0 = arith.constant 0 : i32
    %c0_i32_1 = arith.constant 0 : i32
    return %c0_i32, %c0_i32_0 : i32, i32
  }
  func.func @transform_2(%arg0: i32, %arg1: i32) -> (i32, i32) {
    %c0_i32 = arith.constant 0 : i32
    %c0_i32_0 = arith.constant 0 : i32
    %c0_i32_1 = arith.constant 0 : i32
    return %c0_i32, %c0_i32_0 : i32, i32
  }
  func.func @transform_3(%arg0: i32, %arg1: i32) -> (i32, i32) {
    %c0_i32 = arith.constant 0 : i32
    %c0_i32_0 = arith.constant 0 : i32
    %c0_i32_1 = arith.constant 0 : i32
    return %c0_i32, %c0_i32_0 : i32, i32
  }
  func.func @transform_4(%arg0: i32, %arg1: i32) -> (i32, i32) {
    %c0_i32 = arith.constant 0 : i32
    %c0_i32_0 = arith.constant 0 : i32
    %c0_i32_1 = arith.constant 0 : i32
    return %c0_i32, %c0_i32_0 : i32, i32
  }
  func.func @transform_5(%arg0: i32, %arg1: i32) -> (i32, i32) {
    %c0_i32 = arith.constant 0 : i32
    %c0_i32_0 = arith.constant 0 : i32
    %c0_i32_1 = arith.constant 0 : i32
    return %c0_i32, %c0_i32_0 : i32, i32
  }
  func.func @transform_6(%arg0: i32, %arg1: i32) -> (i32, i32) {
    %c0_i32 = arith.constant 0 : i32
    %c0_i32_0 = arith.constant 0 : i32
    %c0_i32_1 = arith.constant 0 : i32
    return %c0_i32, %c0_i32_0 : i32, i32
  }
  func.func @transform_7(%arg0: i32, %arg1: i32) -> (i32, i32) {
    %c0_i32 = arith.constant 0 : i32
    %c0_i32_0 = arith.constant 0 : i32
    %c0_i32_1 = arith.constant 0 : i32
    return %c0_i32, %c0_i32_0 : i32, i32
  }
  func.func @transform_8(%arg0: i32, %arg1: i32) -> (i32, i32) {
    %c0_i32 = arith.constant 0 : i32
    %c0_i32_0 = arith.constant 0 : i32
    %c0_i32_1 = arith.constant 0 : i32
    return %c0_i32, %c0_i32_0 : i32, i32
  }
  func.func @transform_9(%arg0: i32, %arg1: i32) -> (i32, i32) {
    %c0_i32 = arith.constant 0 : i32
    %c0_i32_0 = arith.constant 0 : i32
    %c0_i32_1 = arith.constant 0 : i32
    return %c0_i32, %c0_i32_0 : i32, i32
  }
  func.func @transform_10(%arg0: i32, %arg1: i32) -> (i32, i32) {
    %c0_i32 = arith.constant 0 : i32
    %c0_i32_0 = arith.constant 0 : i32
    %c0_i32_1 = arith.constant 0 : i32
    return %c0_i32, %c0_i32_0 : i32, i32
  }
  func.func @transform_11(%arg0: i32, %arg1: i32) -> (i32, i32) {
    %c0_i32 = arith.constant 0 : i32
    %c0_i32_0 = arith.constant 0 : i32
    return %c0_i32, %arg1 : i32, i32
  }
  func.func @transform_12(%arg0: i32, %arg1: i32) -> (i32, i32) {
    %c0_i32 = arith.constant 0 : i32
    %c0_i32_0 = arith.constant 0 : i32
    return %c0_i32, %arg1 : i32, i32
  }
  func.func @transform_13(%arg0: i32, %arg1: i32) -> (i32, i32) {
    %c0_i32 = arith.constant 0 : i32
    return %arg0, %arg1 : i32, i32
  }
}

</mosaic_0001>

<bundles_post_ra>
// kernel: tpu_custom_call.1
= control target key start
LH: loop header
LB: loop body
LE: loop exit
PB: predicated region body
PF: predicated region fallthrough
CT: control target
= control target key end

     0   :  { %18 = vsyncpa [#allocation4], 0  ;;  %s5052_s0 = inlined_call_operand.hbm [shape: f32[8,128], index: 0, kind: input, shape index: {}]   ;;  %s5053_s1 = inlined_call_operand.hbm [shape: bf16[128,128], index: 1, kind: input, shape index: {}]   ;;  %s5054_s2 = inlined_call_operand.vmem [shape: f32[1,128], index: 2, kind: input, shape index: {}]   ;;  %s5055_s3 = inlined_call_operand.hbm [shape: bf16[128,128], index: 3, kind: input, shape index: {}]   ;;  %s5056_s4 = inlined_call_operand.hbm [shape: f32[1,128], index: 4, kind: input, shape index: {}]   ;;  %s5057_s5 = inlined_call_operand.hbm [shape: bf16[128,256], index: 5, kind: input, shape index: {}]   ;;  %s5058_s6 = inlined_call_operand.vmem [shape: f32[1,256], index: 6, kind: input, shape index: {}]   ;;  %s5059_s7 = inlined_call_operand.hbm [shape: bf16[256,512], index: 7, kind: input, shape index: {}]   ;;  %s5060_s8 = inlined_call_operand.vmem [shape: f32[1,512], index: 8, kind: input, shape index: {}]   ;;  %s5061_s9 = inlined_call_operand.hbm [shape: bf16[512,1024], index: 9, kind: input, shape index: {}]   ;;  %s5062_s10 = inlined_call_operand.vmem [shape: f32[1,1024], index: 10, kind: input, shape index: {}]   ;;  %s5063_s11 = inlined_call_operand.hbm [shape: bf16[1024,128], index: 11, kind: input, shape index: {}]   ;;  %s5064_s12 = inlined_call_operand.vmem [shape: f32[1,128], index: 12, kind: input, shape index: {}]   ;;  %s5065_s13 = inlined_call_operand.hbm [shape: f32[8,128], index: 13, kind: output, shape index: {}]  }
   0x1   :  { %19 = vsyncpa [#allocation7], 0 }
   0x2   :  { %20 = vsyncpa [#allocation10], 0 }
   0x3   :  { %21 = vsyncpa [#allocation13], 0 }
   0x4   :  { %22 = vsyncpa [#allocation16], 0 }
   0x5   :  { %23 = vsyncpa [#allocation5], 0  ;;  %s4759_s25 = smov [#allocation6]   ;;  %s4549_s29 = scalar_lea.hbm %s5053_s1, 1024 }
   0x6   :  { %s39_s26 = sshll.u32 %s4759_s25, 4  ;;  %p4550_p0 = scmp.ne.s32.totalorder %s5053_s1, %s4549_s29  ;;  %s40_s26 = int_to_ptr.vmem [resolvable:$true] %s39_s26 }
   0x7   :  { %p4553_p1 = scmp.lt.u32.totalorder %s4549_s29, %s5053_s1 }
   0x9   :  { %p4555_p2 = pnand %p4553_p1, %p4550_p0 }
   0xb   :  { %4558 = shalt.err (!%p4555_p2)
}
   0xc   :  { %s4559_s17 = scalar_lea.vmem %s40_s26, 1024  ;;  %p4564_p4 = scmp.lt.s32.totalorder %s40_s26, %s40_s26 }
   0xd   :  { %p4560_p3 = scmp.ne.s32.totalorder %s40_s26, %s4559_s17  ;;  %p4565_p5 = scmp.lt.s32.totalorder %s4559_s17, %s4559_s17 }
   0xf   :  { %p4566_p6 = por %p4565_p5, %p4564_p4 }
  0x11   :  { %p4567_p7 = pnand %p4566_p6, %p4560_p3 }
  0x13   :  { %4570 = shalt.err (!%p4567_p7)
}
  0x14   :  { %s4760_s18 = smov 64   ;;  %s4761_s19 = smov 4  }
  0x15   :  { %45 = dma.hbm_to_vmem [thread:$0]  %s5053_s1, 1024, %s40_s26, [#allocation7], %s4760_s18, %s4760_s18, %s4761_s19  }
  0x16   :  { %s4762_s22 = smov [#allocation9]   ;;  %s4763_s24 = smov [#allocation12]  }
  0x17   :  { %s66_s23 = sshll.u32 %s4762_s22, 4  ;;  %s89_s25 = sshll.u32 %s4763_s24, 4  ;;  %s67_s23 = int_to_ptr.vmem [resolvable:$true] %s66_s23  ;;  %s90_s25 = int_to_ptr.vmem [resolvable:$true] %s89_s25 }
  0x18   :  { %s4571_s29 = scalar_lea.hbm %s5056_s4, 16 }
  0x19   :  { %p4572_p8 = scmp.ne.s32.totalorder %s5056_s4, %s4571_s29  ;;  %p4575_p9 = scmp.lt.u32.totalorder %s4571_s29, %s5056_s4 }
  0x1b   :  { %p4577_p10 = pnand %p4575_p9, %p4572_p8 }
  0x1d   :  { %4580 = shalt.err (!%p4577_p10)
}
  0x1e   :  { %s4581_s1 = scalar_lea.vmem %s67_s23, 16  ;;  %s4585_s26 = scalar_lea.vmem %s67_s23, 32 }
  0x1f   :  { %p4582_p11 = scmp.ne.s32.totalorder %s67_s23, %s4581_s1  ;;  %p4586_p12 = scmp.lt.s32.totalorder %s67_s23, %s67_s23 }
  0x20   :  { %p4587_p13 = scmp.lt.s32.totalorder %s4585_s26, %s4581_s1 }
  0x22   :  { %p4588_p0 = por %p4587_p13, %p4586_p12 }
  0x24   :  { %p4589_p1 = pnand %p4588_p0, %p4582_p11 }
  0x26   :  { %4592 = shalt.err (!%p4589_p1)
}
  0x27   :  { %69 = dma.hbm_to_vmem [thread:$0]  %s5056_s4, 16, %s67_s23, [#allocation10]  }
  0x28   :  { %s4593_s24 = scalar_lea.hbm %s5059_s7, 8192 }
  0x29   :  { %p4594_p2 = scmp.ne.s32.totalorder %s5059_s7, %s4593_s24  ;;  %p4597_p3 = scmp.lt.u32.totalorder %s4593_s24, %s5059_s7 }
  0x2b   :  { %p4599_p4 = pnand %p4597_p3, %p4594_p2 }
  0x2d   :  { %4602 = shalt.err (!%p4599_p4)
}
  0x2e   :  { %s4603_s14 = scalar_lea.vmem %s90_s25, 8192  ;;  %p4608_p6 = scmp.lt.s32.totalorder %s90_s25, %s90_s25 }
  0x2f   :  { %p4604_p5 = scmp.ne.s32.totalorder %s90_s25, %s4603_s14  ;;  %p4609_p7 = scmp.lt.s32.totalorder %s4603_s14, %s4603_s14 }
  0x31   :  { %p4610_p8 = por %p4609_p7, %p4608_p6 }
  0x33   :  { %p4611_p9 = pnand %p4610_p8, %p4604_p5 }
  0x35   :  { %4614 = shalt.err (!%p4611_p9)
}
  0x36   :  { %s4764_s4 = smov 256   ;;  %s4765_s23 = smov 16  }
  0x37   :  { %95 = dma.hbm_to_vmem [thread:$0]  %s5059_s7, 8192, %s90_s25, [#allocation13], %s4764_s4, %s4764_s4, %s4765_s23  }
  0x38   :  { %s4766_s1 = smov [#allocation3]   ;;  %s4767_s17 = smov [#allocation8]  }
  0x39   :  { %s30_s26 = sshll.u32 %s4766_s1, 4  ;;  %s53_s20 = sshll.u32 %s4767_s17, 4  ;;  %s31_s26 = int_to_ptr.vmem [resolvable:$true] %s30_s26  ;;  %s54_s20 = int_to_ptr.vmem [resolvable:$true] %s53_s20 }
  0x3a   :  { %s4615_s24 = scalar_lea.hbm %s5052_s0, 128 }
  0x3b   :  { %p4616_p10 = scmp.ne.s32.totalorder %s5052_s0, %s4615_s24  ;;  %p4619_p11 = scmp.lt.u32.totalorder %s4615_s24, %s5052_s0 }
  0x3d   :  { %p4621_p12 = pnand %p4619_p11, %p4616_p10 }
  0x3f   :  { %4624 = shalt.err (!%p4621_p12)
}
  0x40   :  { %s4625_s7 = scalar_lea.vmem %s31_s26, 128  ;;  %p4630_p0 = scmp.lt.s32.totalorder %s31_s26, %s31_s26 }
  0x41   :  { %p4626_p13 = scmp.ne.s32.totalorder %s31_s26, %s4625_s7  ;;  %p4631_p1 = scmp.lt.s32.totalorder %s4625_s7, %s4625_s7 }
  0x43   :  { %p4632_p2 = por %p4631_p1, %p4630_p0 }
  0x45   :  { %p4633_p3 = pnand %p4632_p2, %p4626_p13 }
  0x47   :  { %4636 = shalt.err (!%p4633_p3)
}
  0x48   :  { %33 = dma.hbm_to_vmem [thread:$0]  %s5052_s0, 128, %s31_s26, [#allocation4]  }
  0x49   :  { %s4637_s15 = scalar_lea.hbm %s5055_s3, 1024 }
  0x4a   :  { %p4638_p4 = scmp.ne.s32.totalorder %s5055_s3, %s4637_s15  ;;  %p4641_p5 = scmp.lt.u32.totalorder %s4637_s15, %s5055_s3 }
  0x4c   :  { %p4643_p6 = pnand %p4641_p5, %p4638_p4 }
  0x4e   :  { %4646 = shalt.err (!%p4643_p6)
}
  0x4f   :  { %s4647_s22 = scalar_lea.vmem %s54_s20, 1024  ;;  %p4652_p8 = scmp.lt.s32.totalorder %s54_s20, %s54_s20 }
  0x50   :  { %p4648_p7 = scmp.ne.s32.totalorder %s54_s20, %s4647_s22  ;;  %p4653_p9 = scmp.lt.s32.totalorder %s4647_s22, %s4647_s22 }
  0x52   :  { %p4654_p10 = por %p4653_p9, %p4652_p8 }
  0x54   :  { %p4655_p11 = pnand %p4654_p10, %p4648_p7 }
  0x56   :  { %4658 = shalt.err (!%p4655_p11)
}
  0x57   :  { %59 = dma.hbm_to_vmem [thread:$0]  %s5055_s3, 1024, %s54_s20, [#allocation7], %s4760_s18, %s4760_s18, %s4761_s19  }
  0x58   :  { %s4768_s24 = smov [#allocation11]   ;;  %s4659_s30 = scalar_lea.hbm %s5057_s5, 2048 }
  0x59   :  { %s75_s27 = sshll.u32 %s4768_s24, 4  ;;  %p4660_p12 = scmp.ne.s32.totalorder %s5057_s5, %s4659_s30  ;;  %s76_s27 = int_to_ptr.vmem [resolvable:$true] %s75_s27 }
  0x5a   :  { %p4663_p13 = scmp.lt.u32.totalorder %s4659_s30, %s5057_s5 }
  0x5c   :  { %p4665_p0 = pnand %p4663_p13, %p4660_p12 }
  0x5e   :  { %4668 = shalt.err (!%p4665_p0)
}
  0x5f   :  { %s4669_s23 = scalar_lea.vmem %s76_s27, 2048  ;;  %p4674_p2 = scmp.lt.s32.totalorder %s76_s27, %s76_s27 }
  0x60   :  { %p4670_p1 = scmp.ne.s32.totalorder %s76_s27, %s4669_s23  ;;  %p4675_p3 = scmp.lt.s32.totalorder %s4669_s23, %s4669_s23 }
  0x62   :  { %p4676_p4 = por %p4675_p3, %p4674_p2 }
  0x64   :  { %p4677_p5 = pnand %p4676_p4, %p4670_p1 }
  0x66   :  { %4680 = shalt.err (!%p4677_p5)
}
  0x67   :  { %s4769_s3 = smov 128   ;;  %s4770_s20 = smov 8  }
  0x68   :  { %81 = dma.hbm_to_vmem [thread:$0]  %s5057_s5, 2048, %s76_s27, [#allocation10], %s4769_s3, %s4769_s3, %s4770_s20  }
  0x69   :  { %s4771_s1 = smov [#allocation14]   ;;  %s4681_s0 = scalar_lea.hbm %s5061_s9, 32768 }
  0x6a   :  { %s103_s17 = sshll.u32 %s4771_s1, 4  ;;  %p4682_p6 = scmp.ne.s32.totalorder %s5061_s9, %s4681_s0  ;;  %s104_s17 = int_to_ptr.vmem [resolvable:$true] %s103_s17 }
  0x6b   :  { %p4685_p7 = scmp.lt.u32.totalorder %s4681_s0, %s5061_s9 }
  0x6d   :  { %p4687_p8 = pnand %p4685_p7, %p4682_p6 }
  0x6f   :  { %4690 = shalt.err (!%p4687_p8)
}
  0x70   :  { %s4691_s30 = scalar_lea.vmem %s104_s17, 32768  ;;  %p4696_p10 = scmp.lt.s32.totalorder %s104_s17, %s104_s17 }
  0x71   :  { %p4692_p9 = scmp.ne.s32.totalorder %s104_s17, %s4691_s30  ;;  %p4697_p11 = scmp.lt.s32.totalorder %s4691_s30, %s4691_s30 }
  0x73   :  { %p4698_p12 = por %p4697_p11, %p4696_p10 }
  0x75   :  { %p4699_p13 = pnand %p4698_p12, %p4692_p9 }
  0x77   :  { %4702 = shalt.err (!%p4699_p13)
}
  0x78   :  { %s4772_s5 = smov 512   ;;  %s4773_s27 = smov 32  }
  0x79   :  { %109 = dma.hbm_to_vmem [thread:$0]  %s5061_s9, 32768, %s104_s17, [#allocation13], %s4772_s5, %s4772_s5, %s4773_s27  }
  0x7a   :  { %s4774_s14 = smov [#allocation15]   ;;  %s4703_s20 = scalar_lea.hbm %s5063_s11, 8192 }
  0x7b   :  { %s117_s4 = sshll.u32 %s4774_s14, 4  ;;  %p4704_p0 = scmp.ne.s32.totalorder %s5063_s11, %s4703_s20  ;;  %s118_s4 = int_to_ptr.vmem [resolvable:$true] %s117_s4 }
  0x7c   :  { %p4707_p1 = scmp.lt.u32.totalorder %s4703_s20, %s5063_s11 }
  0x7e   :  { %p4709_p2 = pnand %p4707_p1, %p4704_p0 }
  0x80   :  { %4712 = shalt.err (!%p4709_p2)
}
  0x81   :  { %s4713_s22 = scalar_lea.vmem %s118_s4, 8192  ;;  %p4718_p4 = scmp.lt.s32.totalorder %s118_s4, %s118_s4 }
  0x82   :  { %p4714_p3 = scmp.ne.s32.totalorder %s118_s4, %s4713_s22  ;;  %p4719_p5 = scmp.lt.s32.totalorder %s4713_s22, %s4713_s22 }
  0x84   :  { %p4720_p6 = por %p4719_p5, %p4718_p4 }
  0x86   :  { %p4721_p7 = pnand %p4720_p6, %p4714_p3 }
  0x88   :  { %4724 = shalt.err (!%p4721_p7)
}
  0x89   :  { %123 = dma.hbm_to_vmem [thread:$0]  %s5063_s11, 8192, %s118_s4, [#allocation16], %s4760_s18, %s4760_s18, %s4761_s19  }
  0x8a   :  { %4747 = dma.done.wait [#allocation4], 128  }
  0x8b   :  { %4748 = vsyncadd [#allocation4], 4294967168 }
  0x8c   :  { %4749 = dma.done.wait [#allocation7], 2048  }
  0x8d   :  { %4750 = vsyncadd [#allocation7], 4294965248 }
  0x8e   :  { %4751 = dma.done.wait [#allocation10], 2064  }
  0x8f   :  { %4752 = vsyncadd [#allocation10], 4294965232 }
  0x90   :  { %4753 = dma.done.wait [#allocation13], 40960  }
  0x91   :  { %4754 = vsyncadd [#allocation13], 4294926336 }
  0x92   :  { %4755 = dma.done.wait [#allocation16], 8192  }
  0x93   :  { %4756 = vsyncadd [#allocation16], 4294959104  ;;  %v4775_v0 = vmov 0.0   ;;  %vm4776_vm0 = vmmov 0   ;;  %v4347_v1 = vld [vmem:[#allocation6] sm:$0xff]   ;;  %v4348_v2 = vld [vmem:[#allocation6 + $0x8] sm:$0xff]  }
  0x94   :  { %4263 = vmatprep.subr.bf16.mxu0 %v4775_v0  ;;  %4279 = vmatprep.mubr.msk.bf16.mxu0 %vm4776_vm0, %v4775_v0  ;;  %v4349_v3 = vld [vmem:[#allocation6 + $0x10] sm:$0xff]   ;;  %v4355_v4 = vld [vmem:[#allocation8] sm:$0xff]   ;;  %v4350_v5 = vld [vmem:[#allocation6 + $0x18] sm:$0xff]   ;;  %v4777_v43 = vmov 0  }
  0x95   :  { %4283 = vmatprep.subr.bf16.mxu1 %v4775_v0  ;;  %4299 = vmatprep.mubr.msk.bf16.mxu1 %vm4776_vm0, %v4775_v0  ;;  %v4356_v6 = vld [vmem:[#allocation8 + $0x8] sm:$0xff]   ;;  %v4351_v7 = vld [vmem:[#allocation6 + $0x20] sm:$0xff]   ;;  %v4357_v8 = vld [vmem:[#allocation8 + $0x10] sm:$0xff]  }
  0x96   :  { %4264 = vmatpush3.bf16.msra.mxu0 %v4347_v1  ;;  %4284 = vmatpush3.bf16.msra.mxu1 %v4355_v4  ;;  %v4352_v9 = vld [vmem:[#allocation6 + $0x28] sm:$0xff]   ;;  %v4358_v10 = vld [vmem:[#allocation8 + $0x18] sm:$0xff]   ;;  %v4353_v11 = vld [vmem:[#allocation6 + $0x30] sm:$0xff]  }
  0x97   :  { %4265 = vmatprep.subr.bf16.mxu0 %v4775_v0  ;;  %4285 = vmatprep.subr.bf16.mxu1 %v4775_v0  ;;  %v4359_v12 = vld [vmem:[#allocation8 + $0x20] sm:$0xff]   ;;  %v4354_v13 = vld [vmem:[#allocation6 + $0x38] sm:$0xff]   ;;  %v4360_v15 = vld [vmem:[#allocation8 + $0x28] sm:$0xff]  }
  0x98   :  { %v155_v14 = vld [vmem:[#allocation3] sm:$0xff]  ;;  %v4361_v17 = vld [vmem:[#allocation8 + $0x30] sm:$0xff]   ;;  %v4363_v19 = vld [vmem:[#allocation11] ss:$8 sps:$4 sm:$0xff]  }
  0x99   :  { %v156_v16 = vpack.c.bf16 %v155_v14, %v155_v14  ;;  %v4362_v18 = vld [vmem:[#allocation8 + $0x38] sm:$0xff]   ;;  %v4365_v20 = vld [vmem:[#allocation11 + $0x4] ss:$8 sps:$4 sm:$0xff]   ;;  %v4369_v24 = vld [vmem:[#allocation11 + $0x20] ss:$8 sps:$4 sm:$0xff]  }
  0x9a   :  { %4266 = vmatpush3.bf16.msra.mxu0 %v4348_v2  ;;  %4286 = vmatpush3.bf16.msra.mxu1 %v4356_v6  ;;  %v4368_v21 = vld [vmem:[#allocation11 + $0x14] ss:$8 sps:$4 sm:$0xff]   ;;  %v4366_v22 = vld [vmem:[#allocation11 + $0x10] ss:$8 sps:$4 sm:$0xff]   ;;  %v4371_v23 = vld [vmem:[#allocation11 + $0x24] ss:$8 sps:$4 sm:$0xff]  }
  0x9b   :  { %4267 = vmatprep.subr.bf16.mxu0 %v4775_v0  ;;  %4287 = vmatprep.subr.bf16.mxu1 %v4775_v0  ;;  %v4374_v25 = vld [vmem:[#allocation11 + $0x34] ss:$8 sps:$4 sm:$0xff]   ;;  %v4372_v26 = vld [vmem:[#allocation11 + $0x30] ss:$8 sps:$4 sm:$0xff]   ;;  %v4377_v27 = vld [vmem:[#allocation11 + $0x44] ss:$8 sps:$4 sm:$0xff]  }
  0x9c   :  { %v4375_v28 = vld [vmem:[#allocation11 + $0x40] ss:$8 sps:$4 sm:$0xff]   ;;  %v4380_v29 = vld [vmem:[#allocation11 + $0x54] ss:$8 sps:$4 sm:$0xff]   ;;  %v4378_v30 = vld [vmem:[#allocation11 + $0x50] ss:$8 sps:$4 sm:$0xff]  }
  0x9d   :  { %v4383_v31 = vld [vmem:[#allocation11 + $0x64] ss:$8 sps:$4 sm:$0xff]   ;;  %v4381_v32 = vld [vmem:[#allocation11 + $0x60] ss:$8 sps:$4 sm:$0xff]   ;;  %v3714_v33 = vld [vmem:[%s5054_s2] ss:$0 sm:$0xff] }
  0x9e   :  { %4268 = vmatpush3.bf16.msra.mxu0 %v4349_v3  ;;  %4288 = vmatpush3.bf16.msra.mxu1 %v4357_v8  ;;  %v4386_v41 = vld [vmem:[#allocation11 + $0x74] ss:$8 sps:$4 sm:$0xff]   ;;  %v4384_v42 = vld [vmem:[#allocation11 + $0x70] ss:$8 sps:$4 sm:$0xff]  }
  0x9f   :  { %4269 = vmatprep.subr.bf16.mxu0 %v4775_v0  ;;  %4289 = vmatprep.subr.bf16.mxu1 %v4775_v0  ;;  %v4387_v44 = vld [vmem:[#allocation12] ss:$16 sps:$4 sm:$0xff]   ;;  %v4389_v45 = vld [vmem:[#allocation12 + $0x4] ss:$16 sps:$4 sm:$0xff]   ;;  %v4392_v46 = vld [vmem:[#allocation12 + $0xc] ss:$16 sps:$4 sm:$0xff]  }
  0xa0   :  { %v4395_v47 = vld [vmem:[#allocation12 + $0x24] ss:$16 sps:$4 sm:$0xff]   ;;  %v4393_v48 = vld [vmem:[#allocation12 + $0x20] ss:$16 sps:$4 sm:$0xff]  }
  0xa1   :  { %v4401_v49 = vld [vmem:[#allocation12 + $0x44] ss:$16 sps:$4 sm:$0xff]   ;;  %v4399_v50 = vld [vmem:[#allocation12 + $0x40] ss:$16 sps:$4 sm:$0xff]  }
  0xa2   :  { %4270 = vmatpush3.bf16.msra.mxu0 %v4350_v5  ;;  %4290 = vmatpush3.bf16.msra.mxu1 %v4358_v10  ;;  %v4407_v51 = vld [vmem:[#allocation12 + $0x64] ss:$16 sps:$4 sm:$0xff]   ;;  %v4405_v52 = vld [vmem:[#allocation12 + $0x60] ss:$16 sps:$4 sm:$0xff]  }
  0xa3   :  { %4271 = vmatprep.subr.bf16.mxu0 %v4775_v0  ;;  %4291 = vmatprep.subr.bf16.mxu1 %v4775_v0  ;;  %v4413_v53 = vld [vmem:[#allocation12 + $0x84] ss:$16 sps:$4 sm:$0xff]   ;;  %v4411_v54 = vld [vmem:[#allocation12 + $0x80] ss:$16 sps:$4 sm:$0xff]  }
  0xa4   :  { %v4419_v55 = vld [vmem:[#allocation12 + $0xa4] ss:$16 sps:$4 sm:$0xff]   ;;  %v4417_v56 = vld [vmem:[#allocation12 + $0xa0] ss:$16 sps:$4 sm:$0xff]  }
  0xa5   :  { %v4425_v57 = vld [vmem:[#allocation12 + $0xc4] ss:$16 sps:$4 sm:$0xff]   ;;  %v4423_v58 = vld [vmem:[#allocation12 + $0xc0] ss:$16 sps:$4 sm:$0xff]  }
  0xa6   :  { %4272 = vmatpush3.bf16.msra.mxu0 %v4351_v7  ;;  %4292 = vmatpush3.bf16.msra.mxu1 %v4359_v12  ;;  %v4431_v59 = vld [vmem:[#allocation12 + $0xe4] ss:$16 sps:$4 sm:$0xff]   ;;  %v4429_v60 = vld [vmem:[#allocation12 + $0xe0] ss:$16 sps:$4 sm:$0xff]  }
  0xa7   :  { %4273 = vmatprep.subr.bf16.mxu0 %v4775_v0  ;;  %4293 = vmatprep.subr.bf16.mxu1 %v4775_v0  ;;  %v4437_v61 = vld [vmem:[#allocation12 + $0x104] ss:$16 sps:$4 sm:$0xff]   ;;  %v4435_v62 = vld [vmem:[#allocation12 + $0x100] ss:$16 sps:$4 sm:$0xff]  }
  0xa8   :  { %v4443_v63 = vld [vmem:[#allocation12 + $0x124] ss:$16 sps:$4 sm:$0xff]   ;;  %v4447_v2 = vld [vmem:[#allocation12 + $0x140] ss:$16 sps:$4 sm:$0xff]  }
  0xa9   :  { %v4449_v1 = vld [vmem:[#allocation12 + $0x144] ss:$16 sps:$4 sm:$0xff]   ;;  %v4453_v4 = vld [vmem:[#allocation12 + $0x160] ss:$16 sps:$4 sm:$0xff]  }
  0xaa   :  { %4274 = vmatpush3.bf16.msra.mxu0 %v4352_v9  ;;  %4294 = vmatpush3.bf16.msra.mxu1 %v4360_v15  ;;  %v4455_v3 = vld [vmem:[#allocation12 + $0x164] ss:$16 sps:$4 sm:$0xff]   ;;  %v4459_v6 = vld [vmem:[#allocation12 + $0x180] ss:$16 sps:$4 sm:$0xff]   ;;  %v3723_v9 = vld [vmem:[#allocation9] ss:$0 sm:$0xff] }
  0xab   :  { %4275 = vmatprep.subr.bf16.mxu0 %v4775_v0  ;;  %4295 = vmatprep.subr.bf16.mxu1 %v4775_v0  ;;  %v4461_v5 = vld [vmem:[#allocation12 + $0x184] ss:$16 sps:$4 sm:$0xff]   ;;  %v4465_v8 = vld [vmem:[#allocation12 + $0x1a0] ss:$16 sps:$4 sm:$0xff]  }
  0xac   :  { %v4467_v7 = vld [vmem:[#allocation12 + $0x1a4] ss:$16 sps:$4 sm:$0xff]  }
  0xae   :  { %4276 = vmatpush3.bf16.msra.mxu0 %v4353_v11  ;;  %4296 = vmatpush3.bf16.msra.mxu1 %v4361_v17 }
  0xaf   :  { %4277 = vmatprep.subr.bf16.mxu0 %v4775_v0  ;;  %4297 = vmatprep.subr.bf16.mxu1 %v4775_v0  ;;  %v4441_v0 = vld [vmem:[#allocation12 + $0x120] ss:$16 sps:$4 sm:$0xff]  }
  0xb2   :  { %4278 = vmatpush3.bf16.msra.mxu0 %v4354_v13  ;;  %4298 = vmatpush3.bf16.msra.mxu1 %v4362_v18  ;;  %v4398_v18 = vld [vmem:[#allocation12 + $0x2c] ss:$16 sps:$4 sm:$0xff]  }
  0xb3   :  { %491 = vmatprep.subr.bf16.mxu0 %v4365_v20  ;;  %942 = vmatprep.subr.bf16.mxu1 %v4389_v45  ;;  %v4404_v20 = vld [vmem:[#allocation12 + $0x4c] ss:$16 sps:$4 sm:$0xff]  }
  0xb4   :  { %v4476_v45 = vld [vmem:[#allocation12 + $0x1cc] ss:$16 sps:$4 sm:$0xff]  }
  0xb5   :  { %4280 = vmatmul.mubr.bf16.vlgmr.msra.gmra.mrb[0].mxu0 %v156_v16  ;;  %v4390_v16 = vld [vmem:[#allocation12 + $0x8] ss:$16 sps:$4 sm:$0xff]  }
  0xb6   :  { %492 = vmatpush1.bf16.msra.mxu0 %v4363_v19  ;;  %523 = vmatprep.mubr.bf16.mxu0 %v4777_v43  ;;  %v4396_v19 = vld [vmem:[#allocation12 + $0x28] ss:$16 sps:$4 sm:$0xff]  }
  0xb7   :  { %493 = vmatprep.subr.bf16.mxu0 %v4368_v21  ;;  %v4402_v21 = vld [vmem:[#allocation12 + $0x48] ss:$16 sps:$4 sm:$0xff]  }
  0xb8   :  { %v4468_v43 = vld [vmem:[#allocation12 + $0x1a8] ss:$16 sps:$4 sm:$0xff]  }
  0xba   :  { %494 = vmatpush1.bf16.msra.mxu0 %v4366_v22  ;;  %v4410_v22 = vld [vmem:[#allocation12 + $0x6c] ss:$16 sps:$4 sm:$0xff]  }
  0xbb   :  { %495 = vmatprep.subr.bf16.mxu0 %v4371_v23  ;;  %v4408_v23 = vld [vmem:[#allocation12 + $0x68] ss:$16 sps:$4 sm:$0xff]  }
  0xbe   :  { %496 = vmatpush1.bf16.msra.mxu0 %v4369_v24  ;;  %v4416_v24 = vld [vmem:[#allocation12 + $0x8c] ss:$16 sps:$4 sm:$0xff]  }
  0xbf   :  { %497 = vmatprep.subr.bf16.mxu0 %v4374_v25  ;;  %v4414_v25 = vld [vmem:[#allocation12 + $0x88] ss:$16 sps:$4 sm:$0xff]  }
  0xc2   :  { %498 = vmatpush1.bf16.msra.mxu0 %v4372_v26  ;;  %v4422_v26 = vld [vmem:[#allocation12 + $0xac] ss:$16 sps:$4 sm:$0xff]  }
  0xc3   :  { %499 = vmatprep.subr.bf16.mxu0 %v4377_v27  ;;  %v4420_v27 = vld [vmem:[#allocation12 + $0xa8] ss:$16 sps:$4 sm:$0xff]  }
  0xc6   :  { %500 = vmatpush1.bf16.msra.mxu0 %v4375_v28  ;;  %v4428_v28 = vld [vmem:[#allocation12 + $0xcc] ss:$16 sps:$4 sm:$0xff]  }
  0xc7   :  { %501 = vmatprep.subr.bf16.mxu0 %v4380_v29  ;;  %v4426_v29 = vld [vmem:[#allocation12 + $0xc8] ss:$16 sps:$4 sm:$0xff]  }
  0xca   :  { %502 = vmatpush1.bf16.msra.mxu0 %v4378_v30  ;;  %v4434_v30 = vld [vmem:[#allocation12 + $0xec] ss:$16 sps:$4 sm:$0xff]  }
  0xcb   :  { %503 = vmatprep.subr.bf16.mxu0 %v4383_v31  ;;  %v4432_v31 = vld [vmem:[#allocation12 + $0xe8] ss:$16 sps:$4 sm:$0xff]  }
  0xce   :  { %504 = vmatpush1.bf16.msra.mxu0 %v4381_v32  ;;  %v4440_v32 = vld [vmem:[#allocation12 + $0x10c] ss:$16 sps:$4 sm:$0xff]  }
  0xcf   :  { %505 = vmatprep.subr.bf16.mxu0 %v4386_v41  ;;  %v4462_v41 = vld [vmem:[#allocation12 + $0x188] ss:$16 sps:$4 sm:$0xff]  }
  0xd2   :  { %506 = vmatpush1.bf16.msra.mxu0 %v4384_v42  ;;  %v4470_v42 = vld [vmem:[#allocation12 + $0x1ac] ss:$16 sps:$4 sm:$0xff]  }
  0xd3   :  { %983 = vmatprep.subr.bf16.mxu0 %v4392_v46  ;;  %v4471_v46 = vld [vmem:[#allocation12 + $0x1c0] ss:$16 sps:$4 sm:$0xff]  }
 0x188   :  { %v262_v34 = vpop.f32.mrb[0].mxu0 }
 0x189   :  { %v263_v35 = vadd.f32 %v3714_v33, %v262_v34  ;;  %v4281_v36 = vpop.f32.mrb[1].mxu0  ;;  %v4438_v33 = vld [vmem:[#allocation12 + $0x108] ss:$16 sps:$4 sm:$0xff]   ;;  %v4446_v34 = vld [vmem:[#allocation12 + $0x12c] ss:$16 sps:$4 sm:$0xff]  }
 0x18a   :  { %v265_v37 = vpop.f32.mrb[2].mxu0  ;;  %v4452_v36 = vld [vmem:[#allocation12 + $0x14c] ss:$16 sps:$4 sm:$0xff]  }
 0x18b   :  { %v268_v38 = vmax.f32 %v263_v35, 0.0  ;;  %v4282_v39 = vpop.f32.mrb[3].mxu0  ;;  %v4444_v35 = vld [vmem:[#allocation12 + $0x128] ss:$16 sps:$4 sm:$0xff]  }
 0x18c   :  { %v4450_v37 = vld [vmem:[#allocation12 + $0x148] ss:$16 sps:$4 sm:$0xff]  }
 0x18d   :  { %v269_v40 = vpack.c.bf16 %v268_v38, %v268_v38  ;;  %v4458_v38 = vld [vmem:[#allocation12 + $0x16c] ss:$16 sps:$4 sm:$0xff]   ;;  %v4456_v39 = vld [vmem:[#allocation12 + $0x168] ss:$16 sps:$4 sm:$0xff]  }
 0x18f   :  { %4300 = vmatmul.mubr.bf16.vlgmr.msra.gmra.mrb[0].mxu1 %v269_v40  ;;  %v4464_v40 = vld [vmem:[#allocation12 + $0x18c] ss:$16 sps:$4 sm:$0xff]  }
 0x190   :  { %943 = vmatpush1.bf16.msra.mxu1 %v4387_v44  ;;  %v4473_v44 = vld [vmem:[#allocation12 + $0x1c4] ss:$16 sps:$4 sm:$0xff]  }
 0x191   :  { %944 = vmatprep.subr.bf16.mxu1 %v4395_v47  ;;  %v4474_v47 = vld [vmem:[#allocation12 + $0x1c8] ss:$16 sps:$4 sm:$0xff]  }
 0x194   :  { %945 = vmatpush1.bf16.msra.mxu1 %v4393_v48  ;;  %v4479_v48 = vld [vmem:[#allocation12 + $0x1e4] ss:$16 sps:$4 sm:$0xff]  }
 0x195   :  { %946 = vmatprep.subr.bf16.mxu1 %v4401_v49  ;;  %v4482_v49 = vld [vmem:[#allocation12 + $0x1ec] ss:$16 sps:$4 sm:$0xff]  }
 0x198   :  { %947 = vmatpush1.bf16.msra.mxu1 %v4399_v50  ;;  %v4477_v50 = vld [vmem:[#allocation12 + $0x1e0] ss:$16 sps:$4 sm:$0xff]  }
 0x199   :  { %948 = vmatprep.subr.bf16.mxu1 %v4407_v51  ;;  %v4480_v51 = vld [vmem:[#allocation12 + $0x1e8] ss:$16 sps:$4 sm:$0xff]  }
 0x19c   :  { %949 = vmatpush1.bf16.msra.mxu1 %v4405_v52  ;;  %v1032_v52 = vld [vmem:[#allocation14] sm:$0xff] }
 0x19d   :  { %950 = vmatprep.subr.bf16.mxu1 %v4413_v53  ;;  %v1036_v53 = vld [vmem:[#allocation14 + $0x20] sm:$0xff] }
 0x1a0   :  { %951 = vmatpush1.bf16.msra.mxu1 %v4411_v54  ;;  %v1033_v54 = vld [vmem:[#allocation14 + $0x8] sm:$0xff] }
 0x1a1   :  { %952 = vmatprep.subr.bf16.mxu1 %v4419_v55  ;;  %v3812_v55 = vcombine.low %v1032_v52, %v1036_v53 }
 0x1a4   :  { %953 = vmatpush1.bf16.msra.mxu1 %v4417_v56  ;;  %v3813_v56 = vcombine.high %v1032_v52, %v1036_v53  ;;  %v1084_v52 = vld [vmem:[#allocation14 + $0x1a0] sm:$0xff]  ;;  %v1081_v53 = vld [vmem:[#allocation14 + $0x188] sm:$0xff] }
 0x1a5   :  { %954 = vmatprep.subr.bf16.mxu1 %v4425_v57  ;;  %v1037_v57 = vld [vmem:[#allocation14 + $0x28] sm:$0xff] }
 0x1a8   :  { %955 = vmatpush1.bf16.msra.mxu1 %v4423_v58  ;;  %v3814_v58 = vcombine.low %v1033_v54, %v1037_v57 }
 0x1a9   :  { %956 = vmatprep.subr.bf16.mxu1 %v4431_v59  ;;  %v3815_v59 = vcombine.high %v1033_v54, %v1037_v57  ;;  %v1085_v54 = vld [vmem:[#allocation14 + $0x1a8] sm:$0xff] }
 0x1ac   :  { %957 = vmatpush1.bf16.msra.mxu1 %v4429_v60  ;;  %v401_v60 = vlaneseq }
 0x1ad   :  { %958 = vmatprep.subr.bf16.mxu1 %v4437_v61 }
 0x1ae   :  { %v4957_v61 = vshrl.u32 %v401_v60, 7  ;;  %v1092_v60 = vld [vmem:[#allocation14 + $0x1e0] sm:$0xff] }
 0x1b0   :  { %959 = vmatpush1.bf16.msra.mxu1 %v4435_v62  ;;  %v4960_v62 = vsub.s32 0, %v4957_v61 }
 0x1b1   :  { %960 = vmatprep.subr.bf16.mxu1 %v4443_v63  ;;  %v399_v63 = vld [vmem:[%s5058_s6] sm:$0x3] }
 0x1b4   :  { %961 = vmatpush1.bf16.msra.mxu1 %v4441_v0  ;;  %v4966_v0 = vsub.s32 1, %v4957_v61 }
 0x1b5   :  { %962 = vmatprep.subr.bf16.mxu1 %v4449_v1  ;;  %v404_v1 = vrot.slane %v399_v63, %v4960_v62 }
 0x1b8   :  { %963 = vmatpush1.bf16.msra.mxu1 %v4447_v2  ;;  %v408_v2 = vrot.slane %v399_v63, %v4966_v0  ;;  %v1089_v63 = vld [vmem:[#allocation14 + $0x1c8] sm:$0xff] }
 0x1b9   :  { %964 = vmatprep.subr.bf16.mxu1 %v4455_v3 }
 0x1bc   :  { %965 = vmatpush1.bf16.msra.mxu1 %v4453_v4 }
 0x1bd   :  { %966 = vmatprep.subr.bf16.mxu1 %v4461_v5 }
 0x1c0   :  { %967 = vmatpush1.bf16.msra.mxu1 %v4459_v6 }
 0x1c1   :  { %968 = vmatprep.subr.bf16.mxu1 %v4467_v7 }
 0x1c4   :  { %969 = vmatpush1.bf16.msra.mxu1 %v4465_v8 }
 0x1c5   :  { %970 = vmatprep.subr.bf16.mxu1 %v4473_v44  ;;  %v1076_v44 = vld [vmem:[#allocation14 + $0x160] sm:$0xff] }
 0x1c8   :  { %971 = vmatpush1.bf16.msra.mxu1 %v4471_v46  ;;  %v1077_v46 = vld [vmem:[#allocation14 + $0x168] sm:$0xff] }
 0x1c9   :  { %972 = vmatprep.subr.bf16.mxu1 %v4479_v48 }
 0x1cc   :  { %973 = vmatpush1.bf16.msra.mxu1 %v4477_v50 }
 0x1cd   :  { %2610 = vmatprep.subr.bf16.mxu1 %v3813_v56 }
 0x262   :  { %v375_v10 = vpop.f32.mrb[0].mxu1 }
 0x263   :  { %v376_v11 = vadd.f32 %v3723_v9, %v375_v10  ;;  %v4301_v12 = vpop.f32.mrb[1].mxu1  ;;  %v1040_v10 = vld [vmem:[#allocation14 + $0x40] sm:$0xff] }
 0x264   :  { %v378_v13 = vpop.f32.mrb[2].mxu1  ;;  %v1044_v12 = vld [vmem:[#allocation14 + $0x60] sm:$0xff] }
 0x265   :  { %v381_v14 = vmax.f32 %v376_v11, 0.0  ;;  %v4302_v15 = vpop.f32.mrb[3].mxu1  ;;  %v1041_v13 = vld [vmem:[#allocation14 + $0x48] sm:$0xff] }
 0x267   :  { %v382_v17 = vpack.c.bf16 %v381_v14, %v381_v14  ;;  %v1045_v14 = vld [vmem:[#allocation14 + $0x68] sm:$0xff] }
 0x269   :  { %524 = vmatmul.mubr.bf16.vlgmr.msra.gmra.mrb[4].mxu0 %v382_v17  ;;  %v3821_v17 = vcombine.high %v1040_v10, %v1044_v12 }
 0x26a   :  { %984 = vmatpush1.bf16.msra.mxu0 %v4390_v16 }
 0x26b   :  { %985 = vmatprep.subr.bf16.mxu0 %v4398_v18  ;;  %v3823_v18 = vcombine.high %v1041_v13, %v1045_v14 }
 0x26e   :  { %986 = vmatpush1.bf16.msra.mxu0 %v4396_v19  ;;  %v1048_v19 = vld [vmem:[#allocation14 + $0x80] sm:$0xff] }
 0x26f   :  { %987 = vmatprep.subr.bf16.mxu0 %v4404_v20  ;;  %v1052_v20 = vld [vmem:[#allocation14 + $0xa0] sm:$0xff] }
 0x272   :  { %988 = vmatpush1.bf16.msra.mxu0 %v4402_v21  ;;  %v1049_v21 = vld [vmem:[#allocation14 + $0x88] sm:$0xff] }
 0x273   :  { %989 = vmatprep.subr.bf16.mxu0 %v4410_v22  ;;  %v1053_v22 = vld [vmem:[#allocation14 + $0xa8] sm:$0xff] }
 0x276   :  { %990 = vmatpush1.bf16.msra.mxu0 %v4408_v23  ;;  %v3820_v23 = vcombine.low %v1040_v10, %v1044_v12 }
 0x277   :  { %991 = vmatprep.subr.bf16.mxu0 %v4416_v24  ;;  %v3822_v24 = vcombine.low %v1041_v13, %v1045_v14  ;;  %v1104_v14 = vld [vmem:[#allocation14 + $0x240] sm:$0xff] }
 0x27a   :  { %992 = vmatpush1.bf16.msra.mxu0 %v4414_v25  ;;  %v3829_v25 = vcombine.high %v1048_v19, %v1052_v20 }
 0x27b   :  { %993 = vmatprep.subr.bf16.mxu0 %v4422_v26  ;;  %v3831_v26 = vcombine.high %v1049_v21, %v1053_v22 }
 0x27e   :  { %994 = vmatpush1.bf16.msra.mxu0 %v4420_v27  ;;  %v1056_v27 = vld [vmem:[#allocation14 + $0xc0] sm:$0xff] }
 0x27f   :  { %995 = vmatprep.subr.bf16.mxu0 %v4428_v28  ;;  %v1060_v28 = vld [vmem:[#allocation14 + $0xe0] sm:$0xff] }
 0x282   :  { %996 = vmatpush1.bf16.msra.mxu0 %v4426_v29  ;;  %v1057_v29 = vld [vmem:[#allocation14 + $0xc8] sm:$0xff] }
 0x283   :  { %997 = vmatprep.subr.bf16.mxu0 %v4434_v30  ;;  %v1061_v30 = vld [vmem:[#allocation14 + $0xe8] sm:$0xff] }
 0x286   :  { %998 = vmatpush1.bf16.msra.mxu0 %v4432_v31  ;;  %v3828_v31 = vcombine.low %v1048_v19, %v1052_v20 }
 0x287   :  { %999 = vmatprep.subr.bf16.mxu0 %v4440_v32  ;;  %v3830_v32 = vcombine.low %v1049_v21, %v1053_v22  ;;  %v1112_v22 = vld [vmem:[#allocation14 + $0x280] sm:$0xff] }
 0x28a   :  { %1000 = vmatpush1.bf16.msra.mxu0 %v4438_v33  ;;  %v3837_v33 = vcombine.high %v1056_v27, %v1060_v28 }
 0x28b   :  { %1001 = vmatprep.subr.bf16.mxu0 %v4446_v34  ;;  %v3839_v34 = vcombine.high %v1057_v29, %v1061_v30 }
 0x28e   :  { %1002 = vmatpush1.bf16.msra.mxu0 %v4444_v35  ;;  %v1064_v35 = vld [vmem:[#allocation14 + $0x100] sm:$0xff] }
 0x28f   :  { %1003 = vmatprep.subr.bf16.mxu0 %v4452_v36  ;;  %v1068_v36 = vld [vmem:[#allocation14 + $0x120] sm:$0xff] }
 0x292   :  { %1004 = vmatpush1.bf16.msra.mxu0 %v4450_v37  ;;  %v1065_v37 = vld [vmem:[#allocation14 + $0x108] sm:$0xff] }
 0x293   :  { %1005 = vmatprep.subr.bf16.mxu0 %v4458_v38  ;;  %v1069_v38 = vld [vmem:[#allocation14 + $0x128] sm:$0xff] }
 0x294   :  { %v3846_v48 = vcombine.low %v1065_v37, %v1069_v38 }
 0x296   :  { %1006 = vmatpush1.bf16.msra.mxu0 %v4456_v39  ;;  %v3836_v39 = vcombine.low %v1056_v27, %v1060_v28 }
 0x297   :  { %1007 = vmatprep.subr.bf16.mxu0 %v4464_v40  ;;  %v3838_v40 = vcombine.low %v1057_v29, %v1061_v30  ;;  %v1120_v30 = vld [vmem:[#allocation14 + $0x2c0] sm:$0xff] }
 0x29a   :  { %1008 = vmatpush1.bf16.msra.mxu0 %v4462_v41  ;;  %v3845_v41 = vcombine.high %v1064_v35, %v1068_v36 }
 0x29b   :  { %1009 = vmatprep.subr.bf16.mxu0 %v4470_v42  ;;  %v3847_v42 = vcombine.high %v1065_v37, %v1069_v38  ;;  %v1128_v38 = vld [vmem:[#allocation14 + $0x300] sm:$0xff] }
 0x29e   :  { %1010 = vmatpush1.bf16.msra.mxu0 %v4468_v43  ;;  %v1072_v43 = vld [vmem:[#allocation14 + $0x140] sm:$0xff] }
 0x29f   :  { %1011 = vmatprep.subr.bf16.mxu0 %v4476_v45  ;;  %v1073_v45 = vld [vmem:[#allocation14 + $0x148] sm:$0xff] }
 0x2a0   :  { %v3855_v50 = vcombine.high %v1073_v45, %v1077_v46  ;;  %v3854_v56 = vcombine.low %v1073_v45, %v1077_v46  ;;  %v1136_v46 = vld [vmem:[#allocation14 + $0x340] sm:$0xff] }
 0x2a2   :  { %1012 = vmatpush1.bf16.msra.mxu0 %v4474_v47  ;;  %v3844_v47 = vcombine.low %v1064_v35, %v1068_v36 }
 0x2a3   :  { %1013 = vmatprep.subr.bf16.mxu0 %v4482_v49  ;;  %v3853_v49 = vcombine.high %v1072_v43, %v1076_v44 }
 0x2a6   :  { %1014 = vmatpush1.bf16.msra.mxu0 %v4480_v51  ;;  %v1080_v51 = vld [vmem:[#allocation14 + $0x180] sm:$0xff] }
 0x2a7   :  { %2692 = vmatprep.subr.bf16.mxu0 %v3815_v59  ;;  %v3861_v57 = vcombine.high %v1080_v51, %v1084_v52  ;;  %v1088_v59 = vld [vmem:[#allocation14 + $0x1c0] sm:$0xff] }
 0x2a8   :  { %v3868_v10 = vcombine.low %v1088_v59, %v1092_v60 }
 0x33c   :  { %v525_v3 = vpop.f32.mrb[4].mxu0 }
 0x33d   :  { %v526_v4 = vadd.f32 %v525_v3, %v404_v1  ;;  %v527_v5 = vpop.f32.mrb[5].mxu0  ;;  %v1093_v1 = vld [vmem:[#allocation14 + $0x1e8] sm:$0xff]  ;;  %v3862_v3 = vcombine.low %v1081_v53, %v1085_v54 }
 0x33e   :  { %v528_v6 = vadd.f32 %v527_v5, %v408_v2  ;;  %v529_v7 = vpop.f32.mrb[6].mxu0  ;;  %v3860_v2 = vcombine.low %v1080_v51, %v1084_v52  ;;  %v3871_v5 = vcombine.high %v1089_v63, %v1093_v1 }
 0x33f   :  { %v532_v8 = vmax.f32 %v526_v4, 0.0  ;;  %v530_v9 = vpop.f32.mrb[7].mxu0  ;;  %v3869_v4 = vcombine.high %v1088_v59, %v1092_v60  ;;  %v1100_v7 = vld [vmem:[#allocation14 + $0x220] sm:$0xff]  ;;  %v1149_v60 = vld [vmem:[#allocation14 + $0x3a8] sm:$0xff] }
 0x340   :  { %v533_v11 = vmax.f32 %v528_v6, 0.0  ;;  %v1096_v6 = vld [vmem:[#allocation14 + $0x200] sm:$0xff]  ;;  %v1101_v9 = vld [vmem:[#allocation14 + $0x228] sm:$0xff] }
 0x341   :  { %v534_v16 = vpack.c.bf16 %v532_v8, %v532_v8  ;;  %v1097_v8 = vld [vmem:[#allocation14 + $0x208] sm:$0xff]  ;;  %v3877_v12 = vcombine.high %v1096_v6, %v1100_v7 }
 0x342   :  { %v535_v15 = vpack.c.bf16 %v533_v11, %v533_v11  ;;  %v3870_v11 = vcombine.low %v1089_v63, %v1093_v1  ;;  %v3879_v13 = vcombine.high %v1097_v8, %v1101_v9  ;;  %v3878_v19 = vcombine.low %v1097_v8, %v1101_v9 }
 0x344   :  { %974 = vmatprep.mubr.bf16.mxu1 %v535_v15  ;;  %1015 = vmatprep.mubr.bf16.mxu0 %v535_v15  ;;  %v1108_v15 = vld [vmem:[#allocation14 + $0x260] sm:$0xff] }
 0x345   :  { %975 = vmatmul.mubr.bf16.vlgmr.msra.gmra.mrb[4].mxu1 %v534_v16  ;;  %1016 = vmatmul.mubr.bf16.vlgmr.msra.gmra.mrb[8].mxu0 %v534_v16  ;;  %v1105_v16 = vld [vmem:[#allocation14 + $0x248] sm:$0xff]  ;;  %v3885_v20 = vcombine.high %v1104_v14, %v1108_v15 }
 0x346   :  { %2611 = vmatpush1.bf16.msra.mxu1 %v3812_v55  ;;  %2693 = vmatpush1.bf16.msra.mxu0 %v3814_v58  ;;  %v3852_v55 = vcombine.low %v1072_v43, %v1076_v44  ;;  %v3863_v58 = vcombine.high %v1081_v53, %v1085_v54 }
 0x347   :  { %2612 = vmatprep.subr.bf16.mxu1 %v3821_v17  ;;  %2694 = vmatprep.subr.bf16.mxu0 %v3823_v18  ;;  %v1109_v17 = vld [vmem:[#allocation14 + $0x268] sm:$0xff]  ;;  %v3876_v18 = vcombine.low %v1096_v6, %v1100_v7 }
 0x348   :  { %v3887_v21 = vcombine.high %v1105_v16, %v1109_v17  ;;  %v3886_v27 = vcombine.low %v1105_v16, %v1109_v17  ;;  %v1157_v7 = vld [vmem:[#allocation14 + $0x3e8] sm:$0xff] }
 0x34a   :  { %2613 = vmatpush1.bf16.msra.mxu1 %v3820_v23  ;;  %2695 = vmatpush1.bf16.msra.mxu0 %v3822_v24  ;;  %v1116_v23 = vld [vmem:[#allocation14 + $0x2a0] sm:$0xff]  ;;  %v1113_v24 = vld [vmem:[#allocation14 + $0x288] sm:$0xff] }
 0x34b   :  { %2614 = vmatprep.subr.bf16.mxu1 %v3829_v25  ;;  %2696 = vmatprep.subr.bf16.mxu0 %v3831_v26  ;;  %v1117_v25 = vld [vmem:[#allocation14 + $0x2a8] sm:$0xff]  ;;  %v3884_v26 = vcombine.low %v1104_v14, %v1108_v15  ;;  %v3893_v28 = vcombine.high %v1112_v22, %v1116_v23 }
 0x34c   :  { %v3895_v29 = vcombine.high %v1113_v24, %v1117_v25  ;;  %v3894_v35 = vcombine.low %v1113_v24, %v1117_v25  ;;  %v1165_v15 = vld [vmem:[#allocation14 + $0x428] sm:$0xff] }
 0x34e   :  { %2615 = vmatpush1.bf16.msra.mxu1 %v3828_v31  ;;  %2697 = vmatpush1.bf16.msra.mxu0 %v3830_v32  ;;  %v1124_v31 = vld [vmem:[#allocation14 + $0x2e0] sm:$0xff]  ;;  %v1121_v32 = vld [vmem:[#allocation14 + $0x2c8] sm:$0xff] }
 0x34f   :  { %2616 = vmatprep.subr.bf16.mxu1 %v3837_v33  ;;  %2698 = vmatprep.subr.bf16.mxu0 %v3839_v34  ;;  %v1125_v33 = vld [vmem:[#allocation14 + $0x2e8] sm:$0xff]  ;;  %v3892_v34 = vcombine.low %v1112_v22, %v1116_v23  ;;  %v3901_v36 = vcombine.high %v1120_v30, %v1124_v31 }
 0x350   :  { %v3903_v37 = vcombine.high %v1121_v32, %v1125_v33  ;;  %v3902_v43 = vcombine.low %v1121_v32, %v1125_v33 }
 0x352   :  { %2617 = vmatpush1.bf16.msra.mxu1 %v3836_v39  ;;  %2699 = vmatpush1.bf16.msra.mxu0 %v3838_v40  ;;  %v1132_v39 = vld [vmem:[#allocation14 + $0x320] sm:$0xff]  ;;  %v1129_v40 = vld [vmem:[#allocation14 + $0x308] sm:$0xff] }
 0x353   :  { %2618 = vmatprep.subr.bf16.mxu1 %v3845_v41  ;;  %2700 = vmatprep.subr.bf16.mxu0 %v3847_v42  ;;  %v1133_v41 = vld [vmem:[#allocation14 + $0x328] sm:$0xff]  ;;  %v3900_v42 = vcombine.low %v1120_v30, %v1124_v31  ;;  %v3909_v44 = vcombine.high %v1128_v38, %v1132_v39 }
 0x354   :  { %v3911_v45 = vcombine.high %v1129_v40, %v1133_v41  ;;  %v3910_v51 = vcombine.low %v1129_v40, %v1133_v41  ;;  %v1169_v40 = vld [vmem:[#allocation14 + $0x448] sm:$0xff] }
 0x355   :  { %v1173_v41 = vld [vmem:[#allocation14 + $0x468] sm:$0xff] }
 0x356   :  { %2619 = vmatpush1.bf16.msra.mxu1 %v3844_v47  ;;  %2701 = vmatpush1.bf16.msra.mxu0 %v3846_v48  ;;  %v1140_v47 = vld [vmem:[#allocation14 + $0x360] sm:$0xff]  ;;  %v1137_v48 = vld [vmem:[#allocation14 + $0x348] sm:$0xff] }
 0x357   :  { %2620 = vmatprep.subr.bf16.mxu1 %v3853_v49  ;;  %2702 = vmatprep.subr.bf16.mxu0 %v3855_v50  ;;  %v1141_v49 = vld [vmem:[#allocation14 + $0x368] sm:$0xff]  ;;  %v3908_v50 = vcombine.low %v1128_v38, %v1132_v39  ;;  %v3917_v52 = vcombine.high %v1136_v46, %v1140_v47  ;;  %v3916_v54 = vcombine.low %v1136_v46, %v1140_v47  ;;  %v1172_v39 = vld [vmem:[#allocation14 + $0x460] sm:$0xff] }
 0x358   :  { %v3919_v53 = vcombine.high %v1137_v48, %v1141_v49  ;;  %v3951_v46 = vcombine.high %v1169_v40, %v1173_v41  ;;  %v1180_v47 = vld [vmem:[#allocation14 + $0x4a0] sm:$0xff] }
 0x35a   :  { %2621 = vmatpush1.bf16.msra.mxu1 %v3852_v55  ;;  %2703 = vmatpush1.bf16.msra.mxu0 %v3854_v56  ;;  %v3918_v55 = vcombine.low %v1137_v48, %v1141_v49  ;;  %v1144_v56 = vld [vmem:[#allocation14 + $0x380] sm:$0xff]  ;;  %v1177_v48 = vld [vmem:[#allocation14 + $0x488] sm:$0xff] }
 0x35b   :  { %2622 = vmatprep.subr.bf16.mxu1 %v3861_v57  ;;  %2704 = vmatprep.subr.bf16.mxu0 %v3863_v58  ;;  %v1148_v57 = vld [vmem:[#allocation14 + $0x3a0] sm:$0xff]  ;;  %v1145_v58 = vld [vmem:[#allocation14 + $0x388] sm:$0xff] }
 0x35c   :  { %v3925_v59 = vcombine.high %v1144_v56, %v1148_v57  ;;  %v3924_v63 = vcombine.low %v1144_v56, %v1148_v57  ;;  %v3926_v1 = vcombine.low %v1145_v58, %v1149_v60  ;;  %v1181_v49 = vld [vmem:[#allocation14 + $0x4a8] sm:$0xff]  ;;  %v1188_v56 = vld [vmem:[#allocation14 + $0x4e0] sm:$0xff] }
 0x35d   :  { %v1185_v57 = vld [vmem:[#allocation14 + $0x4c8] sm:$0xff] }
 0x35e   :  { %2623 = vmatpush1.bf16.msra.mxu1 %v3860_v2  ;;  %2705 = vmatpush1.bf16.msra.mxu0 %v3862_v3  ;;  %v3927_v2 = vcombine.high %v1145_v58, %v1149_v60  ;;  %v1152_v3 = vld [vmem:[#allocation14 + $0x3c0] sm:$0xff]  ;;  %v1189_v58 = vld [vmem:[#allocation14 + $0x4e8] sm:$0xff]  ;;  %v3958_v60 = vcombine.low %v1177_v48, %v1181_v49 }
 0x35f   :  { %2624 = vmatprep.subr.bf16.mxu1 %v3869_v4  ;;  %2706 = vmatprep.subr.bf16.mxu0 %v3871_v5  ;;  %v1156_v4 = vld [vmem:[#allocation14 + $0x3e0] sm:$0xff]  ;;  %v1153_v5 = vld [vmem:[#allocation14 + $0x3c8] sm:$0xff] }
 0x360   :  { %v3933_v6 = vcombine.high %v1152_v3, %v1156_v4  ;;  %v3932_v8 = vcombine.low %v1152_v3, %v1156_v4  ;;  %v3934_v9 = vcombine.low %v1153_v5, %v1157_v7  ;;  %v1196_v3 = vld [vmem:[#allocation14 + $0x520] sm:$0xff]  ;;  %v1193_v4 = vld [vmem:[#allocation14 + $0x508] sm:$0xff] }
 0x362   :  { %2625 = vmatpush1.bf16.msra.mxu1 %v3868_v10  ;;  %2707 = vmatpush1.bf16.msra.mxu0 %v3870_v11  ;;  %v3935_v10 = vcombine.high %v1153_v5, %v1157_v7  ;;  %v1160_v11 = vld [vmem:[#allocation14 + $0x400] sm:$0xff]  ;;  %v1197_v5 = vld [vmem:[#allocation14 + $0x528] sm:$0xff]  ;;  %v3966_v7 = vcombine.low %v1185_v57, %v1189_v58 }
 0x363   :  { %2626 = vmatprep.subr.bf16.mxu1 %v3877_v12  ;;  %2708 = vmatprep.subr.bf16.mxu0 %v3879_v13  ;;  %v1164_v12 = vld [vmem:[#allocation14 + $0x420] sm:$0xff]  ;;  %v1161_v13 = vld [vmem:[#allocation14 + $0x408] sm:$0xff] }
 0x364   :  { %v3941_v14 = vcombine.high %v1160_v11, %v1164_v12  ;;  %v3940_v16 = vcombine.low %v1160_v11, %v1164_v12  ;;  %v3942_v17 = vcombine.low %v1161_v13, %v1165_v15  ;;  %v1204_v11 = vld [vmem:[#allocation14 + $0x560] sm:$0xff]  ;;  %v1201_v12 = vld [vmem:[#allocation14 + $0x548] sm:$0xff] }
 0x366   :  { %2627 = vmatpush1.bf16.msra.mxu1 %v3876_v18  ;;  %2709 = vmatpush1.bf16.msra.mxu0 %v3878_v19  ;;  %v3943_v18 = vcombine.high %v1161_v13, %v1165_v15  ;;  %v4973_v19 = vld [vmem:[%s5060_s8] sm:$0xf]  ;;  %v1205_v13 = vld [vmem:[#allocation14 + $0x568] sm:$0xff]  ;;  %v3974_v15 = vcombine.low %v1193_v4, %v1197_v5 }
 0x367   :  { %2628 = vmatprep.subr.bf16.mxu1 %v3885_v20  ;;  %2710 = vmatprep.subr.bf16.mxu0 %v3887_v21  ;;  %v616_v20 = vsub.s32 3, %v4957_v61  ;;  %v605_v21 = vrot.slane %v4973_v19, %v4960_v62  ;;  %v609_v22 = vrot.slane %v4973_v19, %v4966_v0 }
 0x369   :  { %v617_v23 = vrot.slane %v4973_v19, %v616_v20 }
 0x36a   :  { %2629 = vmatpush1.bf16.msra.mxu1 %v3884_v26  ;;  %2711 = vmatpush1.bf16.msra.mxu0 %v3886_v27 }
 0x36b   :  { %2630 = vmatprep.subr.bf16.mxu1 %v3893_v28  ;;  %2712 = vmatprep.subr.bf16.mxu0 %v3895_v29 }
 0x36e   :  { %2631 = vmatpush1.bf16.msra.mxu1 %v3892_v34  ;;  %2713 = vmatpush1.bf16.msra.mxu0 %v3894_v35 }
 0x36f   :  { %2632 = vmatprep.subr.bf16.mxu1 %v3901_v36  ;;  %2714 = vmatprep.subr.bf16.mxu0 %v3903_v37  ;;  %v1168_v37 = vld [vmem:[#allocation14 + $0x440] sm:$0xff] }
 0x372   :  { %2633 = vmatpush1.bf16.msra.mxu1 %v3900_v42  ;;  %2715 = vmatpush1.bf16.msra.mxu0 %v3902_v43 }
 0x373   :  { %2634 = vmatprep.subr.bf16.mxu1 %v3909_v44  ;;  %2716 = vmatprep.subr.bf16.mxu0 %v3911_v45  ;;  %v1176_v44 = vld [vmem:[#allocation14 + $0x480] sm:$0xff]  ;;  %v3949_v45 = vcombine.high %v1168_v37, %v1172_v39 }
 0x376   :  { %2635 = vmatpush1.bf16.msra.mxu1 %v3908_v50  ;;  %2717 = vmatpush1.bf16.msra.mxu0 %v3910_v51  ;;  %v3948_v51 = vcombine.low %v1168_v37, %v1172_v39  ;;  %v1224_v37 = vld [vmem:[#allocation14 + $0x600] sm:$0xff]  ;;  %v1225_v39 = vld [vmem:[#allocation14 + $0x608] sm:$0xff] }
 0x377   :  { %2636 = vmatprep.subr.bf16.mxu1 %v3917_v52  ;;  %2718 = vmatprep.subr.bf16.mxu0 %v3919_v53  ;;  %v3950_v52 = vcombine.low %v1169_v40, %v1173_v41  ;;  %v3957_v53 = vcombine.high %v1176_v44, %v1180_v47  ;;  %v1229_v40 = vld [vmem:[#allocation14 + $0x628] sm:$0xff] }
 0x37a   :  { %2637 = vmatpush1.bf16.msra.mxu1 %v3916_v54  ;;  %2719 = vmatpush1.bf16.msra.mxu0 %v3918_v55  ;;  %v3959_v54 = vcombine.high %v1177_v48, %v1181_v49  ;;  %v1184_v55 = vld [vmem:[#allocation14 + $0x4c0] sm:$0xff]  ;;  %v1233_v49 = vld [vmem:[#allocation14 + $0x648] sm:$0xff] }
 0x37b   :  { %2638 = vmatprep.subr.bf16.mxu1 %v3925_v59  ;;  %2720 = vmatprep.subr.bf16.mxu0 %v3927_v2  ;;  %v3956_v59 = vcombine.low %v1176_v44, %v1180_v47  ;;  %v1192_v2 = vld [vmem:[#allocation14 + $0x500] sm:$0xff] }
 0x37c   :  { %v1232_v47 = vld [vmem:[#allocation14 + $0x640] sm:$0xff] }
 0x37d   :  { %v1236_v48 = vld [vmem:[#allocation14 + $0x660] sm:$0xff] }
 0x37e   :  { %2639 = vmatpush1.bf16.msra.mxu1 %v3924_v63  ;;  %2721 = vmatpush1.bf16.msra.mxu0 %v3926_v1  ;;  %v3965_v63 = vcombine.high %v1184_v55, %v1188_v56  ;;  %v3967_v1 = vcombine.high %v1185_v57, %v1189_v58  ;;  %v1244_v57 = vld [vmem:[#allocation14 + $0x6a0] sm:$0xff]  ;;  %v1241_v58 = vld [vmem:[#allocation14 + $0x688] sm:$0xff] }
 0x37f   :  { %2640 = vmatprep.subr.bf16.mxu1 %v3933_v6  ;;  %2722 = vmatprep.subr.bf16.mxu0 %v3935_v10  ;;  %v3964_v6 = vcombine.low %v1184_v55, %v1188_v56  ;;  %v1200_v10 = vld [vmem:[#allocation14 + $0x540] sm:$0xff] }
 0x380   :  { %v1240_v56 = vld [vmem:[#allocation14 + $0x680] sm:$0xff] }
 0x382   :  { %2641 = vmatpush1.bf16.msra.mxu1 %v3932_v8  ;;  %2723 = vmatpush1.bf16.msra.mxu0 %v3934_v9  ;;  %v3973_v8 = vcombine.high %v1192_v2, %v1196_v3  ;;  %v3975_v9 = vcombine.high %v1193_v4, %v1197_v5  ;;  %v1252_v4 = vld [vmem:[#allocation14 + $0x6e0] sm:$0xff]  ;;  %v1249_v5 = vld [vmem:[#allocation14 + $0x6c8] sm:$0xff] }
 0x383   :  { %2651 = vmatprep.subr.bf16.mxu1 %v3941_v14  ;;  %2733 = vmatprep.subr.bf16.mxu0 %v3943_v18  ;;  %v3972_v14 = vcombine.low %v1192_v2, %v1196_v3  ;;  %v1208_v18 = vld [vmem:[#allocation14 + $0x580] sm:$0xff] }
 0x384   :  { %v1248_v3 = vld [vmem:[#allocation14 + $0x6c0] sm:$0xff] }
 0x418   :  { %v976_v24 = vpop.f32.mrb[4].mxu1  ;;  %v4983_v25 = vpop.f32.mrb[8].mxu0 }
 0x419   :  { %v977_v26 = vadd.f32 %v976_v24, %v605_v21  ;;  %v978_v27 = vpop.f32.mrb[5].mxu1  ;;  %v1019_v28 = vpop.f32.mrb[9].mxu0  ;;  %v1212_v21 = vld [vmem:[#allocation14 + $0x5a0] sm:$0xff]  ;;  %v3980_v24 = vcombine.low %v1200_v10, %v1204_v11 }
 0x41a   :  { %v979_v29 = vadd.f32 %v978_v27, %v609_v22  ;;  %v1020_v30 = vadd.f32 %v1019_v28, %v617_v23  ;;  %v980_v31 = vpop.f32.mrb[6].mxu1  ;;  %v1021_v32 = vpop.f32.mrb[10].mxu0  ;;  %v1209_v22 = vld [vmem:[#allocation14 + $0x588] sm:$0xff]  ;;  %v3989_v27 = vcombine.high %v1208_v18, %v1212_v21 }
 0x41b   :  { %v1024_v33 = vmax.f32 %v977_v26, 0.0  ;;  %v981_v34 = vpop.f32.mrb[7].mxu1  ;;  %v1022_v35 = vpop.f32.mrb[11].mxu0  ;;  %v1213_v23 = vld [vmem:[#allocation14 + $0x5a8] sm:$0xff]  ;;  %v3982_v26 = vcombine.low %v1201_v12, %v1205_v13 }
 0x41c   :  { %v1025_v36 = vmax.f32 %v979_v29, 0.0  ;;  %v1027_v38 = vmax.f32 %v1020_v30, 0.0  ;;  %v3991_v28 = vcombine.high %v1209_v22, %v1213_v23  ;;  %v1216_v29 = vld [vmem:[#allocation14 + $0x5c0] sm:$0xff]  ;;  %v1217_v31 = vld [vmem:[#allocation14 + $0x5c8] sm:$0xff]  ;;  %v3990_v34 = vcombine.low %v1209_v22, %v1213_v23 }
 0x41d   :  { %v4987_v43 = vpack.c.bf16 %v1024_v33, %v1024_v33  ;;  %v1220_v30 = vld [vmem:[#allocation14 + $0x5e0] sm:$0xff]  ;;  %v1221_v32 = vld [vmem:[#allocation14 + $0x5e8] sm:$0xff]  ;;  %v3988_v33 = vcombine.low %v1208_v18, %v1212_v21 }
 0x41e   :  { %v4985_v42 = vpack.c.bf16 %v1025_v36, %v1025_v36  ;;  %v4991_v50 = vpack.c.bf16 %v1027_v38, %v1027_v38  ;;  %v3997_v35 = vcombine.high %v1216_v29, %v1220_v30  ;;  %v3999_v36 = vcombine.high %v1217_v31, %v1221_v32  ;;  %v1228_v38 = vld [vmem:[#allocation14 + $0x620] sm:$0xff]  ;;  %v1265_v23 = vld [vmem:[#allocation14 + $0x748] sm:$0xff] }
 0x41f   :  { %v3996_v41 = vcombine.low %v1216_v29, %v1220_v30  ;;  %v3998_v44 = vcombine.low %v1217_v31, %v1221_v32  ;;  %v1264_v21 = vld [vmem:[#allocation14 + $0x740] sm:$0xff] }
 0x420   :  { %2642 = vmatprep.mubr.bf16.mxu1 %v4985_v42  ;;  %2724 = vmatprep.mubr.bf16.mxu0 %v4985_v42  ;;  %v1268_v22 = vld [vmem:[#allocation14 + $0x760] sm:$0xff] }
 0x421   :  { %2643 = vmatmul.mubr.bf16.vlgmr.msra.gmra.mrb[8].mxu1 %v4987_v43  ;;  %2725 = vmatmul.mubr.bf16.vlgmr.msra.gmra.mrb[12].mxu0 %v4987_v43  ;;  %v4045_v29 = vcombine.high %v1264_v21, %v1268_v22  ;;  %v1272_v31 = vld [vmem:[#allocation14 + $0x780] sm:$0xff] }
 0x422   :  { %2652 = vmatpush1.bf16.msra.mxu1 %v3940_v16  ;;  %2734 = vmatpush1.bf16.msra.mxu0 %v3942_v17  ;;  %v3981_v16 = vcombine.high %v1200_v10, %v1204_v11  ;;  %v3983_v17 = vcombine.high %v1201_v12, %v1205_v13  ;;  %v1256_v11 = vld [vmem:[#allocation14 + $0x700] sm:$0xff]  ;;  %v1257_v13 = vld [vmem:[#allocation14 + $0x708] sm:$0xff] }
 0x423   :  { %2683 = vmatprep.mubr.bf16.mxu1 %v4991_v50  ;;  %2765 = vmatprep.mubr.bf16.mxu0 %v4991_v50  ;;  %v1260_v12 = vld [vmem:[#allocation14 + $0x720] sm:$0xff] }
 0x424   :  { %2653 = vmatprep.subr.bf16.mxu1 %v3949_v45  ;;  %2735 = vmatprep.subr.bf16.mxu0 %v3951_v46  ;;  %v4005_v45 = vcombine.high %v1224_v37, %v1228_v38  ;;  %v4007_v46 = vcombine.high %v1225_v39, %v1229_v40  ;;  %v1276_v32 = vld [vmem:[#allocation14 + $0x7a0] sm:$0xff] }
 0x426   :  { %2654 = vmatpush1.bf16.msra.mxu1 %v3948_v51  ;;  %2736 = vmatpush1.bf16.msra.mxu0 %v3950_v52  ;;  %v1237_v51 = vld [vmem:[#allocation14 + $0x668] sm:$0xff]  ;;  %v4004_v52 = vcombine.low %v1224_v37, %v1228_v38  ;;  %v4053_v38 = vcombine.high %v1272_v31, %v1276_v32 }
 0x427   :  { %2655 = vmatprep.subr.bf16.mxu1 %v3957_v53  ;;  %2737 = vmatprep.subr.bf16.mxu0 %v3959_v54  ;;  %v4006_v53 = vcombine.low %v1225_v39, %v1229_v40  ;;  %v4013_v54 = vcombine.high %v1232_v47, %v1236_v48  ;;  %v4015_v55 = vcombine.high %v1233_v49, %v1237_v51  ;;  %v1280_v40 = vld [vmem:[#allocation14 + $0x7c0] sm:$0xff] }
 0x42a   :  { %2656 = vmatpush1.bf16.msra.mxu1 %v3956_v59  ;;  %2738 = vmatpush1.bf16.msra.mxu0 %v3958_v60  ;;  %v1245_v59 = vld [vmem:[#allocation14 + $0x6a8] sm:$0xff]  ;;  %v4012_v60 = vcombine.low %v1232_v47, %v1236_v48 }
 0x42b   :  { %2657 = vmatprep.subr.bf16.mxu1 %v3965_v63  ;;  %2739 = vmatprep.subr.bf16.mxu0 %v3967_v1  ;;  %v4014_v63 = vcombine.low %v1233_v49, %v1237_v51  ;;  %v4021_v1 = vcombine.high %v1240_v56, %v1244_v57  ;;  %v4023_v2 = vcombine.high %v1241_v58, %v1245_v59 }
 0x42e   :  { %2658 = vmatpush1.bf16.msra.mxu1 %v3964_v6  ;;  %2740 = vmatpush1.bf16.msra.mxu0 %v3966_v7  ;;  %v1253_v6 = vld [vmem:[#allocation14 + $0x6e8] sm:$0xff]  ;;  %v4020_v7 = vcombine.low %v1240_v56, %v1244_v57 }
 0x42f   :  { %2659 = vmatprep.subr.bf16.mxu1 %v3973_v8  ;;  %2741 = vmatprep.subr.bf16.mxu0 %v3975_v9  ;;  %v4022_v8 = vcombine.low %v1241_v58, %v1245_v59  ;;  %v4029_v9 = vcombine.high %v1248_v3, %v1252_v4  ;;  %v4031_v10 = vcombine.high %v1249_v5, %v1253_v6 }
 0x432   :  { %2660 = vmatpush1.bf16.msra.mxu1 %v3972_v14  ;;  %2742 = vmatpush1.bf16.msra.mxu0 %v3974_v15  ;;  %v1261_v14 = vld [vmem:[#allocation14 + $0x728] sm:$0xff]  ;;  %v4028_v15 = vcombine.low %v1248_v3, %v1252_v4 }
 0x433   :  { %2661 = vmatprep.subr.bf16.mxu1 %v3981_v16  ;;  %2743 = vmatprep.subr.bf16.mxu0 %v3983_v17  ;;  %v4030_v16 = vcombine.low %v1249_v5, %v1253_v6  ;;  %v4037_v17 = vcombine.high %v1256_v11, %v1260_v12  ;;  %v4039_v18 = vcombine.high %v1257_v13, %v1261_v14 }
 0x436   :  { %2662 = vmatpush1.bf16.msra.mxu1 %v3980_v24  ;;  %2744 = vmatpush1.bf16.msra.mxu0 %v3982_v26  ;;  %v1269_v24 = vld [vmem:[#allocation14 + $0x768] sm:$0xff]  ;;  %v4036_v26 = vcombine.low %v1256_v11, %v1260_v12 }
 0x437   :  { %2663 = vmatprep.subr.bf16.mxu1 %v3989_v27  ;;  %2745 = vmatprep.subr.bf16.mxu0 %v3991_v28  ;;  %v4038_v27 = vcombine.low %v1257_v13, %v1261_v14  ;;  %v612_v28 = vsub.s32 2, %v4957_v61  ;;  %v4047_v30 = vcombine.high %v1265_v23, %v1269_v24 }
 0x439   :  { %v613_v37 = vrot.slane %v4973_v19, %v612_v28  ;;  %v1038_v19 = vld [vmem:[#allocation14 + $0x30] sm:$0xff] }
 0x43a   :  { %2664 = vmatpush1.bf16.msra.mxu1 %v3988_v33  ;;  %2746 = vmatpush1.bf16.msra.mxu0 %v3990_v34  ;;  %v1273_v33 = vld [vmem:[#allocation14 + $0x788] sm:$0xff] }
 0x43b   :  { %2665 = vmatprep.subr.bf16.mxu1 %v3997_v35  ;;  %2747 = vmatprep.subr.bf16.mxu0 %v3999_v36  ;;  %v1277_v34 = vld [vmem:[#allocation14 + $0x7a8] sm:$0xff]  ;;  %v4044_v35 = vcombine.low %v1264_v21, %v1268_v22  ;;  %v4046_v36 = vcombine.low %v1265_v23, %v1269_v24  ;;  %v1018_v48 = vadd.f32 %v4983_v25, %v613_v37  ;;  %v1043_v25 = vld [vmem:[#allocation14 + $0x58] sm:$0xff] }
 0x43c   :  { %v4055_v39 = vcombine.high %v1273_v33, %v1277_v34  ;;  %v4054_v47 = vcombine.low %v1273_v33, %v1277_v34  ;;  %v1074_v34 = vld [vmem:[#allocation14 + $0x150] sm:$0xff]  ;;  %v1079_v37 = vld [vmem:[#allocation14 + $0x178] sm:$0xff] }
 0x43d   :  { %v1026_v57 = vmax.f32 %v1018_v48, 0.0 }
 0x43e   :  { %2666 = vmatpush1.bf16.msra.mxu1 %v3996_v41  ;;  %2748 = vmatpush1.bf16.msra.mxu0 %v3998_v44  ;;  %v1284_v41 = vld [vmem:[#allocation14 + $0x7e0] sm:$0xff]  ;;  %v1281_v44 = vld [vmem:[#allocation14 + $0x7c8] sm:$0xff] }
 0x43f   :  { %2667 = vmatprep.subr.bf16.mxu1 %v4005_v45  ;;  %2749 = vmatprep.subr.bf16.mxu0 %v4007_v46  ;;  %v1285_v45 = vld [vmem:[#allocation14 + $0x7e8] sm:$0xff]  ;;  %v4052_v46 = vcombine.low %v1272_v31, %v1276_v32  ;;  %v4061_v49 = vcombine.high %v1280_v40, %v1284_v41  ;;  %v5002_v3 = vpack.c.bf16 %v1026_v57, %v1026_v57 }
 0x440   :  { %v4063_v51 = vcombine.high %v1281_v44, %v1285_v45  ;;  %v4062_v56 = vcombine.low %v1281_v44, %v1285_v45  ;;  %v1082_v44 = vld [vmem:[#allocation14 + $0x190] sm:$0xff] }
 0x441   :  { %v1086_v45 = vld [vmem:[#allocation14 + $0x1b0] sm:$0xff] }
 0x442   :  { %2668 = vmatpush1.bf16.msra.mxu1 %v4004_v52  ;;  %2750 = vmatpush1.bf16.msra.mxu0 %v4006_v53  ;;  %v1034_v52 = vld [vmem:[#allocation14 + $0x10] sm:$0xff]  ;;  %v1035_v53 = vld [vmem:[#allocation14 + $0x18] sm:$0xff] }
 0x443   :  { %2669 = vmatprep.subr.bf16.mxu1 %v4013_v54  ;;  %2751 = vmatprep.subr.bf16.mxu0 %v4015_v55  ;;  %v1039_v54 = vld [vmem:[#allocation14 + $0x38] sm:$0xff]  ;;  %v4060_v55 = vcombine.low %v1280_v40, %v1284_v41  ;;  %v3817_v58 = vcombine.high %v1034_v52, %v1038_v19 }
 0x444   :  { %v3819_v59 = vcombine.high %v1035_v53, %v1039_v54  ;;  %v3818_v4 = vcombine.low %v1035_v53, %v1039_v54  ;;  %v1094_v53 = vld [vmem:[#allocation14 + $0x1f0] sm:$0xff]  ;;  %v1091_v54 = vld [vmem:[#allocation14 + $0x1d8] sm:$0xff] }
 0x446   :  { %2670 = vmatpush1.bf16.msra.mxu1 %v4012_v60  ;;  %2752 = vmatpush1.bf16.msra.mxu0 %v4014_v63  ;;  %v1042_v60 = vld [vmem:[#allocation14 + $0x50] sm:$0xff] }
 0x447   :  { %2671 = vmatprep.subr.bf16.mxu1 %v4021_v1  ;;  %2753 = vmatprep.subr.bf16.mxu0 %v4023_v2  ;;  %v1046_v63 = vld [vmem:[#allocation14 + $0x70] sm:$0xff]  ;;  %v1047_v1 = vld [vmem:[#allocation14 + $0x78] sm:$0xff]  ;;  %v3816_v2 = vcombine.low %v1034_v52, %v1038_v19 }
 0x448   :  { %v3825_v5 = vcombine.high %v1042_v60, %v1046_v63  ;;  %v3827_v6 = vcombine.high %v1043_v25, %v1047_v1  ;;  %v3824_v11 = vcombine.low %v1042_v60, %v1046_v63  ;;  %v3826_v12 = vcombine.low %v1043_v25, %v1047_v1  ;;  %v1090_v19 = vld [vmem:[#allocation14 + $0x1d0] sm:$0xff]  ;;  %v1099_v25 = vld [vmem:[#allocation14 + $0x218] sm:$0xff] }
 0x449   :  { %v1098_v60 = vld [vmem:[#allocation14 + $0x210] sm:$0xff]  ;;  %v1103_v1 = vld [vmem:[#allocation14 + $0x238] sm:$0xff] }
 0x44a   :  { %2672 = vmatpush1.bf16.msra.mxu1 %v4020_v7  ;;  %2754 = vmatpush1.bf16.msra.mxu0 %v4022_v8  ;;  %v1050_v7 = vld [vmem:[#allocation14 + $0x90] sm:$0xff] }
 0x44b   :  { %2673 = vmatprep.subr.bf16.mxu1 %v4029_v9  ;;  %2755 = vmatprep.subr.bf16.mxu0 %v4031_v10  ;;  %v1054_v8 = vld [vmem:[#allocation14 + $0xb0] sm:$0xff]  ;;  %v1051_v9 = vld [vmem:[#allocation14 + $0x98] sm:$0xff] }
 0x44c   :  { %v1055_v10 = vld [vmem:[#allocation14 + $0xb8] sm:$0xff]  ;;  %v3833_v13 = vcombine.high %v1050_v7, %v1054_v8  ;;  %v3832_v21 = vcombine.low %v1050_v7, %v1054_v8  ;;  %v1102_v63 = vld [vmem:[#allocation14 + $0x230] sm:$0xff] }
 0x44d   :  { %v3835_v14 = vcombine.high %v1051_v9, %v1055_v10  ;;  %v3834_v22 = vcombine.low %v1051_v9, %v1055_v10  ;;  %v1106_v7 = vld [vmem:[#allocation14 + $0x250] sm:$0xff]  ;;  %v1107_v9 = vld [vmem:[#allocation14 + $0x258] sm:$0xff] }
 0x44e   :  { %2674 = vmatpush1.bf16.msra.mxu1 %v4028_v15  ;;  %2756 = vmatpush1.bf16.msra.mxu0 %v4030_v16  ;;  %v1058_v15 = vld [vmem:[#allocation14 + $0xd0] sm:$0xff]  ;;  %v1111_v10 = vld [vmem:[#allocation14 + $0x278] sm:$0xff] }
 0x44f   :  { %2675 = vmatprep.subr.bf16.mxu1 %v4037_v17  ;;  %2757 = vmatprep.subr.bf16.mxu0 %v4039_v18  ;;  %v1062_v16 = vld [vmem:[#allocation14 + $0xf0] sm:$0xff]  ;;  %v1059_v17 = vld [vmem:[#allocation14 + $0xd8] sm:$0xff] }
 0x450   :  { %v1063_v18 = vld [vmem:[#allocation14 + $0xf8] sm:$0xff]  ;;  %v3841_v23 = vcombine.high %v1058_v15, %v1062_v16  ;;  %v1110_v8 = vld [vmem:[#allocation14 + $0x270] sm:$0xff] }
 0x451   :  { %v3843_v24 = vcombine.high %v1059_v17, %v1063_v18  ;;  %v3842_v31 = vcombine.low %v1059_v17, %v1063_v18  ;;  %v1115_v17 = vld [vmem:[#allocation14 + $0x298] sm:$0xff] }
 0x452   :  { %2676 = vmatpush1.bf16.msra.mxu1 %v4036_v26  ;;  %2758 = vmatpush1.bf16.msra.mxu0 %v4038_v27  ;;  %v1066_v26 = vld [vmem:[#allocation14 + $0x110] sm:$0xff]  ;;  %v1119_v18 = vld [vmem:[#allocation14 + $0x2b8] sm:$0xff] }
 0x453   :  { %2677 = vmatprep.subr.bf16.mxu1 %v4045_v29  ;;  %2759 = vmatprep.subr.bf16.mxu0 %v4047_v30  ;;  %v1070_v27 = vld [vmem:[#allocation14 + $0x130] sm:$0xff]  ;;  %v1071_v29 = vld [vmem:[#allocation14 + $0x138] sm:$0xff]  ;;  %v3840_v30 = vcombine.low %v1058_v15, %v1062_v16 }
 0x454   :  { %v3849_v32 = vcombine.high %v1066_v26, %v1070_v27  ;;  %v1114_v15 = vld [vmem:[#allocation14 + $0x290] sm:$0xff] }
 0x455   :  { %v1118_v16 = vld [vmem:[#allocation14 + $0x2b0] sm:$0xff] }
 0x456   :  { %2678 = vmatpush1.bf16.msra.mxu1 %v4044_v35  ;;  %2760 = vmatpush1.bf16.msra.mxu0 %v4046_v36  ;;  %v1078_v35 = vld [vmem:[#allocation14 + $0x170] sm:$0xff]  ;;  %v1075_v36 = vld [vmem:[#allocation14 + $0x158] sm:$0xff] }
 0x457   :  { %2679 = vmatprep.subr.bf16.mxu1 %v4053_v38  ;;  %2761 = vmatprep.subr.bf16.mxu0 %v4055_v39  ;;  %v3848_v38 = vcombine.low %v1066_v26, %v1070_v27  ;;  %v3857_v40 = vcombine.high %v1074_v34, %v1078_v35  ;;  %v3859_v41 = vcombine.high %v1075_v36, %v1079_v37  ;;  %v1122_v26 = vld [vmem:[#allocation14 + $0x2d0] sm:$0xff] }
 0x458   :  { %v3856_v48 = vcombine.low %v1074_v34, %v1078_v35  ;;  %v1126_v27 = vld [vmem:[#allocation14 + $0x2f0] sm:$0xff] }
 0x459   :  { %v1130_v34 = vld [vmem:[#allocation14 + $0x310] sm:$0xff] }
 0x45a   :  { %2680 = vmatpush1.bf16.msra.mxu1 %v4052_v46  ;;  %2762 = vmatpush1.bf16.msra.mxu0 %v4054_v47  ;;  %v1083_v46 = vld [vmem:[#allocation14 + $0x198] sm:$0xff]  ;;  %v1134_v35 = vld [vmem:[#allocation14 + $0x330] sm:$0xff] }
 0x45b   :  { %2681 = vmatprep.subr.bf16.mxu1 %v4061_v49  ;;  %2763 = vmatprep.subr.bf16.mxu0 %v4063_v51  ;;  %v1087_v47 = vld [vmem:[#allocation14 + $0x1b8] sm:$0xff]  ;;  %v3858_v49 = vcombine.low %v1075_v36, %v1079_v37  ;;  %v3865_v51 = vcombine.high %v1082_v44, %v1086_v45 }
 0x45c   :  { %v3867_v52 = vcombine.high %v1083_v46, %v1087_v47  ;;  %v3866_v57 = vcombine.low %v1083_v46, %v1087_v47  ;;  %v1131_v36 = vld [vmem:[#allocation14 + $0x318] sm:$0xff] }
 0x45d   :  { %v1135_v37 = vld [vmem:[#allocation14 + $0x338] sm:$0xff] }
 0x45e   :  { %2682 = vmatpush1.bf16.msra.mxu1 %v4060_v55  ;;  %2764 = vmatpush1.bf16.msra.mxu0 %v4062_v56  ;;  %v1095_v55 = vld [vmem:[#allocation14 + $0x1f8] sm:$0xff]  ;;  %v3864_v56 = vcombine.low %v1082_v44, %v1086_v45  ;;  %v1138_v44 = vld [vmem:[#allocation14 + $0x350] sm:$0xff] }
 0x45f   :  { %2774 = vmatprep.subr.bf16.mxu1 %v3817_v58  ;;  %2856 = vmatprep.subr.bf16.mxu0 %v3819_v59  ;;  %v3873_v58 = vcombine.high %v1090_v19, %v1094_v53  ;;  %v3875_v59 = vcombine.high %v1091_v54, %v1095_v55  ;;  %v1142_v45 = vld [vmem:[#allocation14 + $0x370] sm:$0xff]  ;;  %v1139_v46 = vld [vmem:[#allocation14 + $0x358] sm:$0xff] }
 0x460   :  { %v1143_v47 = vld [vmem:[#allocation14 + $0x378] sm:$0xff] }
 0x461   :  { %2684 = vmatmul.mubr.bf16.vlgmr.msra.gmra.mrb[8].mxu1 %v5002_v3  ;;  %2766 = vmatmul.mubr.bf16.vlgmr.msra.gmra.mrb[12].mxu0 %v5002_v3 }
 0x462   :  { %2775 = vmatpush1.bf16.msra.mxu1 %v3816_v2  ;;  %2806 = vmatprep.mubr.bf16.mxu1 %v4985_v42  ;;  %v3872_v2 = vcombine.low %v1090_v19, %v1094_v53  ;;  %v1146_v19 = vld [vmem:[#allocation14 + $0x390] sm:$0xff] }
 0x463   :  { %2857 = vmatpush1.bf16.msra.mxu0 %v3818_v4  ;;  %2888 = vmatprep.mubr.bf16.mxu0 %v4985_v42  ;;  %v1067_v42 = vld [vmem:[#allocation14 + $0x118] sm:$0xff]  ;;  %v3874_v4 = vcombine.low %v1091_v54, %v1095_v55  ;;  %v1150_v53 = vld [vmem:[#allocation14 + $0x3b0] sm:$0xff] }
 0x464   :  { %2776 = vmatprep.subr.bf16.mxu1 %v3825_v5  ;;  %2858 = vmatprep.subr.bf16.mxu0 %v3827_v6  ;;  %v3851_v33 = vcombine.high %v1067_v42, %v1071_v29  ;;  %v3850_v39 = vcombine.low %v1067_v42, %v1071_v29  ;;  %v3881_v5 = vcombine.high %v1098_v60, %v1102_v63  ;;  %v1123_v42 = vld [vmem:[#allocation14 + $0x2d8] sm:$0xff] }
 0x465   :  { %v3883_v6 = vcombine.high %v1099_v25, %v1103_v1  ;;  %v1127_v29 = vld [vmem:[#allocation14 + $0x2f8] sm:$0xff] }
 0x466   :  { %2777 = vmatpush1.bf16.msra.mxu1 %v3824_v11  ;;  %v3880_v11 = vcombine.low %v1098_v60, %v1102_v63  ;;  %v1147_v54 = vld [vmem:[#allocation14 + $0x398] sm:$0xff]  ;;  %v1154_v60 = vld [vmem:[#allocation14 + $0x3d0] sm:$0xff] }
 0x467   :  { %2859 = vmatpush1.bf16.msra.mxu0 %v3826_v12  ;;  %2778 = vmatprep.subr.bf16.mxu1 %v3833_v13  ;;  %v3882_v12 = vcombine.low %v1099_v25, %v1103_v1  ;;  %v3889_v13 = vcombine.high %v1106_v7, %v1110_v8  ;;  %v1151_v55 = vld [vmem:[#allocation14 + $0x3b8] sm:$0xff]  ;;  %v1158_v63 = vld [vmem:[#allocation14 + $0x3f0] sm:$0xff] }
 0x468   :  { %2860 = vmatprep.subr.bf16.mxu0 %v3835_v14  ;;  %v3891_v14 = vcombine.high %v1107_v9, %v1111_v10  ;;  %v1155_v25 = vld [vmem:[#allocation14 + $0x3d8] sm:$0xff] }
 0x469   :  { %v1159_v1 = vld [vmem:[#allocation14 + $0x3f8] sm:$0xff] }
 0x46a   :  { %2779 = vmatpush1.bf16.msra.mxu1 %v3832_v21  ;;  %v3888_v21 = vcombine.low %v1106_v7, %v1110_v8  ;;  %v1162_v7 = vld [vmem:[#allocation14 + $0x410] sm:$0xff] }
 0x46b   :  { %2861 = vmatpush1.bf16.msra.mxu0 %v3834_v22  ;;  %2780 = vmatprep.subr.bf16.mxu1 %v3841_v23  ;;  %v3890_v22 = vcombine.low %v1107_v9, %v1111_v10  ;;  %v3897_v23 = vcombine.high %v1114_v15, %v1118_v16  ;;  %v1166_v8 = vld [vmem:[#allocation14 + $0x430] sm:$0xff]  ;;  %v1163_v9 = vld [vmem:[#allocation14 + $0x418] sm:$0xff] }
 0x46c   :  { %2862 = vmatprep.subr.bf16.mxu0 %v3843_v24  ;;  %v3899_v24 = vcombine.high %v1115_v17, %v1119_v18  ;;  %v1167_v10 = vld [vmem:[#allocation14 + $0x438] sm:$0xff] }
 0x46e   :  { %2781 = vmatpush1.bf16.msra.mxu1 %v3840_v30  ;;  %v3896_v30 = vcombine.low %v1114_v15, %v1118_v16  ;;  %v1170_v15 = vld [vmem:[#allocation14 + $0x450] sm:$0xff] }
 0x46f   :  { %2863 = vmatpush1.bf16.msra.mxu0 %v3842_v31  ;;  %2782 = vmatprep.subr.bf16.mxu1 %v3849_v32  ;;  %v3898_v31 = vcombine.low %v1115_v17, %v1119_v18  ;;  %v3905_v32 = vcombine.high %v1122_v26, %v1126_v27  ;;  %v1174_v16 = vld [vmem:[#allocation14 + $0x470] sm:$0xff]  ;;  %v3944_v17 = vcombine.low %v1162_v7, %v1166_v8  ;;  %v1171_v18 = vld [vmem:[#allocation14 + $0x458] sm:$0xff] }
 0x470   :  { %2864 = vmatprep.subr.bf16.mxu0 %v3851_v33  ;;  %v3907_v33 = vcombine.high %v1123_v42, %v1127_v29 }
 0x472   :  { %2783 = vmatpush1.bf16.msra.mxu1 %v3848_v38  ;;  %v3904_v38 = vcombine.low %v1122_v26, %v1126_v27  ;;  %v1182_v26 = vld [vmem:[#allocation14 + $0x4b0] sm:$0xff] }
 0x473   :  { %2865 = vmatpush1.bf16.msra.mxu0 %v3850_v39  ;;  %2784 = vmatprep.subr.bf16.mxu1 %v3857_v40  ;;  %v3906_v39 = vcombine.low %v1123_v42, %v1127_v29  ;;  %v3913_v40 = vcombine.high %v1130_v34, %v1134_v35  ;;  %v1179_v42 = vld [vmem:[#allocation14 + $0x498] sm:$0xff] }
 0x474   :  { %2866 = vmatprep.subr.bf16.mxu0 %v3859_v41  ;;  %v3915_v41 = vcombine.high %v1131_v36, %v1135_v37  ;;  %v1183_v29 = vld [vmem:[#allocation14 + $0x4b8] sm:$0xff] }
 0x476   :  { %2785 = vmatpush1.bf16.msra.mxu1 %v3856_v48  ;;  %v3912_v48 = vcombine.low %v1130_v34, %v1134_v35  ;;  %v1186_v34 = vld [vmem:[#allocation14 + $0x4d0] sm:$0xff] }
 0x477   :  { %2867 = vmatpush1.bf16.msra.mxu0 %v3858_v49  ;;  %2786 = vmatprep.subr.bf16.mxu1 %v3865_v51  ;;  %v3914_v49 = vcombine.low %v1131_v36, %v1135_v37  ;;  %v3921_v51 = vcombine.high %v1138_v44, %v1142_v45  ;;  %v1190_v35 = vld [vmem:[#allocation14 + $0x4f0] sm:$0xff]  ;;  %v1187_v36 = vld [vmem:[#allocation14 + $0x4d8] sm:$0xff] }
 0x478   :  { %2868 = vmatprep.subr.bf16.mxu0 %v3867_v52  ;;  %v3923_v52 = vcombine.high %v1139_v46, %v1143_v47  ;;  %v1191_v37 = vld [vmem:[#allocation14 + $0x4f8] sm:$0xff] }
 0x47a   :  { %2787 = vmatpush1.bf16.msra.mxu1 %v3864_v56  ;;  %v3920_v56 = vcombine.low %v1138_v44, %v1142_v45  ;;  %v1198_v44 = vld [vmem:[#allocation14 + $0x530] sm:$0xff]  ;;  %v1195_v45 = vld [vmem:[#allocation14 + $0x518] sm:$0xff] }
 0x47b   :  { %2869 = vmatpush1.bf16.msra.mxu0 %v3866_v57  ;;  %2788 = vmatprep.subr.bf16.mxu1 %v3873_v58  ;;  %v3922_v57 = vcombine.low %v1139_v46, %v1143_v47  ;;  %v3929_v58 = vcombine.high %v1146_v19, %v1150_v53  ;;  %v1199_v46 = vld [vmem:[#allocation14 + $0x538] sm:$0xff]  ;;  %v3970_v47 = vcombine.low %v1187_v36, %v1191_v37 }
 0x47c   :  { %2870 = vmatprep.subr.bf16.mxu0 %v3875_v59  ;;  %v3931_v59 = vcombine.high %v1147_v54, %v1151_v55 }
 0x47e   :  { %2789 = vmatpush1.bf16.msra.mxu1 %v3872_v2  ;;  %v3928_v2 = vcombine.low %v1146_v19, %v1150_v53  ;;  %v1203_v19 = vld [vmem:[#allocation14 + $0x558] sm:$0xff] }
 0x47f   :  { %2871 = vmatpush1.bf16.msra.mxu0 %v3874_v4  ;;  %2790 = vmatprep.subr.bf16.mxu1 %v3881_v5  ;;  %v3930_v4 = vcombine.low %v1147_v54, %v1151_v55  ;;  %v3937_v5 = vcombine.high %v1154_v60, %v1158_v63  ;;  %v1207_v53 = vld [vmem:[#allocation14 + $0x578] sm:$0xff]  ;;  %v3978_v55 = vcombine.low %v1195_v45, %v1199_v46 }
 0x480   :  { %2872 = vmatprep.subr.bf16.mxu0 %v3883_v6  ;;  %v3939_v6 = vcombine.high %v1155_v25, %v1159_v1 }
 0x482   :  { %2791 = vmatpush1.bf16.msra.mxu1 %v3880_v11  ;;  %v3936_v11 = vcombine.low %v1154_v60, %v1158_v63  ;;  %v1211_v60 = vld [vmem:[#allocation14 + $0x598] sm:$0xff] }
 0x483   :  { %2873 = vmatpush1.bf16.msra.mxu0 %v3882_v12  ;;  %2792 = vmatprep.subr.bf16.mxu1 %v3889_v13  ;;  %v3938_v12 = vcombine.low %v1155_v25, %v1159_v1  ;;  %v3945_v13 = vcombine.high %v1162_v7, %v1166_v8  ;;  %v1215_v63 = vld [vmem:[#allocation14 + $0x5b8] sm:$0xff]  ;;  %v3986_v1 = vcombine.low %v1203_v19, %v1207_v53 }
 0x484   :  { %2874 = vmatprep.subr.bf16.mxu0 %v3891_v14  ;;  %v3947_v14 = vcombine.high %v1163_v9, %v1167_v10  ;;  %v1219_v7 = vld [vmem:[#allocation14 + $0x5d8] sm:$0xff] }
 0x485   :  { %v1223_v8 = vld [vmem:[#allocation14 + $0x5f8] sm:$0xff] }
 0x486   :  { %2793 = vmatpush1.bf16.msra.mxu1 %v3888_v21  ;;  %v1175_v21 = vld [vmem:[#allocation14 + $0x478] sm:$0xff] }
 0x487   :  { %2875 = vmatpush1.bf16.msra.mxu0 %v3890_v22  ;;  %2794 = vmatprep.subr.bf16.mxu1 %v3897_v23  ;;  %v3946_v22 = vcombine.low %v1163_v9, %v1167_v10  ;;  %v3953_v23 = vcombine.high %v1170_v15, %v1174_v16  ;;  %v3955_v27 = vcombine.high %v1171_v18, %v1175_v21 }
 0x488   :  { %2876 = vmatprep.subr.bf16.mxu0 %v3899_v24  ;;  %v1178_v24 = vld [vmem:[#allocation14 + $0x490] sm:$0xff]  ;;  %v3994_v10 = vcombine.low %v1211_v60, %v1215_v63 }
 0x48a   :  { %2795 = vmatpush1.bf16.msra.mxu1 %v3896_v30  ;;  %v3952_v30 = vcombine.low %v1170_v15, %v1174_v16  ;;  %v1227_v15 = vld [vmem:[#allocation14 + $0x618] sm:$0xff] }
 0x48b   :  { %2877 = vmatpush1.bf16.msra.mxu0 %v3898_v31  ;;  %2796 = vmatprep.subr.bf16.mxu1 %v3905_v32  ;;  %v3954_v31 = vcombine.low %v1171_v18, %v1175_v21  ;;  %v3961_v32 = vcombine.high %v1178_v24, %v1182_v26  ;;  %v1231_v16 = vld [vmem:[#allocation14 + $0x638] sm:$0xff]  ;;  %v4002_v18 = vcombine.low %v1219_v7, %v1223_v8 }
 0x48c   :  { %2878 = vmatprep.subr.bf16.mxu0 %v3907_v33  ;;  %v3963_v33 = vcombine.high %v1179_v42, %v1183_v29 }
 0x48e   :  { %2797 = vmatpush1.bf16.msra.mxu1 %v3904_v38  ;;  %v3960_v38 = vcombine.low %v1178_v24, %v1182_v26  ;;  %v1238_v24 = vld [vmem:[#allocation14 + $0x670] sm:$0xff]  ;;  %v1235_v26 = vld [vmem:[#allocation14 + $0x658] sm:$0xff] }
 0x48f   :  { %2879 = vmatpush1.bf16.msra.mxu0 %v3906_v39  ;;  %2798 = vmatprep.subr.bf16.mxu1 %v3913_v40  ;;  %v3969_v39 = vcombine.high %v1186_v34, %v1190_v35  ;;  %v3971_v40 = vcombine.high %v1187_v36, %v1191_v37 }
 0x490   :  { %2880 = vmatprep.subr.bf16.mxu0 %v3915_v41  ;;  %v1194_v41 = vld [vmem:[#allocation14 + $0x510] sm:$0xff] }
 0x491   :  { %v3976_v54 = vcombine.low %v1194_v41, %v1198_v44 }
 0x492   :  { %2799 = vmatpush1.bf16.msra.mxu1 %v3912_v48  ;;  %v3977_v48 = vcombine.high %v1194_v41, %v1198_v44  ;;  %v1251_v41 = vld [vmem:[#allocation14 + $0x6d8] sm:$0xff] }
 0x493   :  { %2881 = vmatpush1.bf16.msra.mxu0 %v3914_v49  ;;  %2800 = vmatprep.subr.bf16.mxu1 %v3921_v51  ;;  %v3979_v49 = vcombine.high %v1195_v45, %v1199_v46  ;;  %v1202_v51 = vld [vmem:[#allocation14 + $0x550] sm:$0xff]  ;;  %v1255_v44 = vld [vmem:[#allocation14 + $0x6f8] sm:$0xff] }
 0x494   :  { %2882 = vmatprep.subr.bf16.mxu0 %v3923_v52  ;;  %v1206_v52 = vld [vmem:[#allocation14 + $0x570] sm:$0xff] }
 0x495   :  { %v3984_v25 = vcombine.low %v1202_v51, %v1206_v52 }
 0x496   :  { %2801 = vmatpush1.bf16.msra.mxu1 %v3920_v56  ;;  %v3985_v56 = vcombine.high %v1202_v51, %v1206_v52  ;;  %v1259_v51 = vld [vmem:[#allocation14 + $0x718] sm:$0xff] }
 0x497   :  { %2883 = vmatpush1.bf16.msra.mxu0 %v3922_v57  ;;  %2802 = vmatprep.subr.bf16.mxu1 %v3929_v58  ;;  %v3987_v57 = vcombine.high %v1203_v19, %v1207_v53  ;;  %v1210_v58 = vld [vmem:[#allocation14 + $0x590] sm:$0xff]  ;;  %v1263_v52 = vld [vmem:[#allocation14 + $0x738] sm:$0xff]  ;;  %v4034_v53 = vcombine.low %v1251_v41, %v1255_v44 }
 0x498   :  { %2884 = vmatprep.subr.bf16.mxu0 %v3931_v59  ;;  %v1214_v59 = vld [vmem:[#allocation14 + $0x5b0] sm:$0xff] }
 0x499   :  { %v3992_v9 = vcombine.low %v1210_v58, %v1214_v59 }
 0x49a   :  { %2803 = vmatpush1.bf16.msra.mxu1 %v3928_v2  ;;  %v3993_v2 = vcombine.high %v1210_v58, %v1214_v59  ;;  %v1267_v58 = vld [vmem:[#allocation14 + $0x758] sm:$0xff] }
 0x49b   :  { %2885 = vmatpush1.bf16.msra.mxu0 %v3930_v4  ;;  %2804 = vmatprep.subr.bf16.mxu1 %v3937_v5  ;;  %v3995_v4 = vcombine.high %v1211_v60, %v1215_v63  ;;  %v1218_v5 = vld [vmem:[#allocation14 + $0x5d0] sm:$0xff]  ;;  %v1271_v59 = vld [vmem:[#allocation14 + $0x778] sm:$0xff]  ;;  %v4042_v63 = vcombine.low %v1259_v51, %v1263_v52 }
 0x49c   :  { %2886 = vmatprep.subr.bf16.mxu0 %v3939_v6  ;;  %v1222_v6 = vld [vmem:[#allocation14 + $0x5f0] sm:$0xff] }
 0x49e   :  { %2805 = vmatpush1.bf16.msra.mxu1 %v3936_v11  ;;  %v4001_v11 = vcombine.high %v1218_v5, %v1222_v6 }
 0x49f   :  { %2887 = vmatpush1.bf16.msra.mxu0 %v3938_v12  ;;  %2815 = vmatprep.subr.bf16.mxu1 %v3945_v13  ;;  %v4003_v12 = vcombine.high %v1219_v7, %v1223_v8  ;;  %v1226_v13 = vld [vmem:[#allocation14 + $0x610] sm:$0xff]  ;;  %v4050_v8 = vcombine.low %v1267_v58, %v1271_v59 }
 0x4a0   :  { %2897 = vmatprep.subr.bf16.mxu0 %v3947_v14  ;;  %v1230_v14 = vld [vmem:[#allocation14 + $0x630] sm:$0xff] }
 0x4a1   :  { %2807 = vmatmul.mubr.bf16.vlgmr.msra.gmra.mrb[12].mxu1 %v4987_v43  ;;  %v4009_v21 = vcombine.high %v1226_v13, %v1230_v14 }
 0x4a2   :  { %2889 = vmatmul.mubr.bf16.vlgmr.msra.gmra.mrb[16].mxu0 %v4987_v43  ;;  %2816 = vmatpush1.bf16.msra.mxu1 %v3944_v17  ;;  %v3962_v43 = vcombine.low %v1179_v42, %v1183_v29  ;;  %v4000_v17 = vcombine.low %v1218_v5, %v1222_v6  ;;  %v4008_v42 = vcombine.low %v1226_v13, %v1230_v14  ;;  %v1275_v5 = vld [vmem:[#allocation14 + $0x798] sm:$0xff] }
 0x4a3   :  { %2847 = vmatprep.mubr.bf16.mxu1 %v4991_v50  ;;  %2898 = vmatpush1.bf16.msra.mxu0 %v3946_v22  ;;  %v4011_v22 = vcombine.high %v1227_v15, %v1231_v16  ;;  %v4010_v29 = vcombine.low %v1227_v15, %v1231_v16  ;;  %v1279_v6 = vld [vmem:[#allocation14 + $0x7b8] sm:$0xff] }
 0x4a4   :  { %2929 = vmatprep.mubr.bf16.mxu0 %v4991_v50  ;;  %2817 = vmatprep.subr.bf16.mxu1 %v3953_v23  ;;  %v3968_v50 = vcombine.low %v1186_v34, %v1190_v35  ;;  %v1234_v23 = vld [vmem:[#allocation14 + $0x650] sm:$0xff]  ;;  %v1243_v34 = vld [vmem:[#allocation14 + $0x698] sm:$0xff]  ;;  %v4058_v16 = vcombine.low %v1275_v5, %v1279_v6 }
 0x4a5   :  { %2899 = vmatprep.subr.bf16.mxu0 %v3955_v27  ;;  %v1239_v27 = vld [vmem:[#allocation14 + $0x678] sm:$0xff]  ;;  %v4016_v36 = vcombine.low %v1234_v23, %v1238_v24 }
 0x4a6   :  { %2818 = vmatpush1.bf16.msra.mxu1 %v3952_v30  ;;  %v4017_v30 = vcombine.high %v1234_v23, %v1238_v24  ;;  %v1247_v35 = vld [vmem:[#allocation14 + $0x6b8] sm:$0xff]  ;;  %v4018_v37 = vcombine.low %v1235_v26, %v1239_v27  ;;  %v4483_v23 = vld [vmem:[#allocation15 + $0x40] sm:$0xff]  }
 0x4a7   :  { %2900 = vmatpush1.bf16.msra.mxu0 %v3954_v31  ;;  %2819 = vmatprep.subr.bf16.mxu1 %v3961_v32  ;;  %v4019_v31 = vcombine.high %v1235_v26, %v1239_v27  ;;  %v1242_v32 = vld [vmem:[#allocation14 + $0x690] sm:$0xff]  ;;  %v4026_v46 = vcombine.low %v1243_v34, %v1247_v35  ;;  %v1283_v13 = vld [vmem:[#allocation14 + $0x7d8] sm:$0xff]  ;;  %v4484_v24 = vld [vmem:[#allocation15 + $0xc0] sm:$0xff]  }
 0x4a8   :  { %2901 = vmatprep.subr.bf16.mxu0 %v3963_v33  ;;  %v1246_v33 = vld [vmem:[#allocation14 + $0x6b0] sm:$0xff]  ;;  %v1287_v14 = vld [vmem:[#allocation14 + $0x7f8] sm:$0xff]  ;;  %v4485_v26 = vld [vmem:[#allocation15] sm:$0xff]  }
 0x4a9   :  { %v4024_v45 = vcombine.low %v1242_v32, %v1246_v33  ;;  %v4486_v27 = vld [vmem:[#allocation15 + $0x80] sm:$0xff]  }
 0x4aa   :  { %2820 = vmatpush1.bf16.msra.mxu1 %v3960_v38  ;;  %v4025_v38 = vcombine.high %v1242_v32, %v1246_v33  ;;  %v4491_v32 = vld [vmem:[#allocation15 + $0x50] sm:$0xff]  }
 0x4ab   :  { %2902 = vmatpush1.bf16.msra.mxu0 %v3962_v43  ;;  %2821 = vmatprep.subr.bf16.mxu1 %v3969_v39  ;;  %v4027_v43 = vcombine.high %v1243_v34, %v1247_v35  ;;  %v1250_v39 = vld [vmem:[#allocation14 + $0x6d0] sm:$0xff] }
 0x4ac   :  { %2903 = vmatprep.subr.bf16.mxu0 %v3971_v40  ;;  %v1254_v40 = vld [vmem:[#allocation14 + $0x6f0] sm:$0xff] }
 0x4ad   :  { %v4032_v19 = vcombine.low %v1250_v39, %v1254_v40  ;;  %v4492_v33 = vld [vmem:[#allocation15 + $0xd0] sm:$0xff]  }
 0x4ae   :  { %2822 = vmatpush1.bf16.msra.mxu1 %v3968_v50  ;;  %v4033_v50 = vcombine.high %v1250_v39, %v1254_v40  ;;  %v4493_v34 = vld [vmem:[#allocation15 + $0x10] sm:$0xff]   ;;  %v4500_v39 = vld [vmem:[#allocation15 + $0xe0] sm:$0xff]  }
 0x4af   :  { %2904 = vmatpush1.bf16.msra.mxu0 %v3970_v47  ;;  %2823 = vmatprep.subr.bf16.mxu1 %v3977_v48  ;;  %v4035_v47 = vcombine.high %v1251_v41, %v1255_v44  ;;  %v1258_v48 = vld [vmem:[#allocation14 + $0x710] sm:$0xff]  ;;  %v4501_v40 = vld [vmem:[#allocation15 + $0x20] sm:$0xff]   ;;  %v4503_v44 = vld [vmem:[#allocation15 + $0x68] sm:$0xff]  }
 0x4b0   :  { %2905 = vmatprep.subr.bf16.mxu0 %v3979_v49  ;;  %v1262_v49 = vld [vmem:[#allocation14 + $0x730] sm:$0xff]  ;;  %v4502_v41 = vld [vmem:[#allocation15 + $0xa0] sm:$0xff]  }
 0x4b1   :  { %v4040_v60 = vcombine.low %v1258_v48, %v1262_v49  ;;  %v4494_v35 = vld [vmem:[#allocation15 + $0x90] sm:$0xff]  }
 0x4b2   :  { %2824 = vmatpush1.bf16.msra.mxu1 %v3976_v54  ;;  %v4041_v54 = vcombine.high %v1258_v48, %v1262_v49  ;;  %v4508_v48 = vld [vmem:[#allocation15 + $0xf0] sm:$0xff]  }
 0x4b3   :  { %2906 = vmatpush1.bf16.msra.mxu0 %v3978_v55  ;;  %2825 = vmatprep.subr.bf16.mxu1 %v3985_v56  ;;  %v4043_v55 = vcombine.high %v1259_v51, %v1263_v52  ;;  %v1266_v56 = vld [vmem:[#allocation14 + $0x750] sm:$0xff]  ;;  %v4511_v52 = vld [vmem:[#allocation15 + $0x78] sm:$0xff]  }
 0x4b4   :  { %2907 = vmatprep.subr.bf16.mxu0 %v3987_v57  ;;  %v1270_v57 = vld [vmem:[#allocation14 + $0x770] sm:$0xff] }
 0x4b5   :  { %v4048_v7 = vcombine.low %v1266_v56, %v1270_v57  ;;  %v4509_v49 = vld [vmem:[#allocation15 + $0x30] sm:$0xff]  }
 0x4b6   :  { %2826 = vmatpush1.bf16.msra.mxu1 %v3984_v25  ;;  %v4049_v25 = vcombine.high %v1266_v56, %v1270_v57  ;;  %v4510_v51 = vld [vmem:[#allocation15 + $0xb0] sm:$0xff]   ;;  %v4516_v56 = vld [vmem:[#allocation15 + $0x1c0] sm:$0xff]  }
 0x4b7   :  { %2908 = vmatpush1.bf16.msra.mxu0 %v3986_v1  ;;  %2827 = vmatprep.subr.bf16.mxu1 %v3993_v2  ;;  %v4051_v1 = vcombine.high %v1267_v58, %v1271_v59  ;;  %v1274_v2 = vld [vmem:[#allocation14 + $0x790] sm:$0xff] }
 0x4b8   :  { %2909 = vmatprep.subr.bf16.mxu0 %v3995_v4  ;;  %v1278_v4 = vld [vmem:[#allocation14 + $0x7b0] sm:$0xff] }
 0x4b9   :  { %v4056_v15 = vcombine.low %v1274_v2, %v1278_v4  ;;  %v5017_v57 = vld [vmem:[%s5062_s10] sm:$0xff] }
 0x4ba   :  { %2828 = vmatpush1.bf16.msra.mxu1 %v3992_v9  ;;  %v4057_v9 = vcombine.high %v1274_v2, %v1278_v4  ;;  %v1293_v58 = vrot.slane %v5017_v57, %v4960_v62  ;;  %v1301_v59 = vrot.slane %v5017_v57, %v612_v28 }
 0x4bb   :  { %2910 = vmatpush1.bf16.msra.mxu0 %v3994_v10  ;;  %2829 = vmatprep.subr.bf16.mxu1 %v4001_v11  ;;  %v4059_v10 = vcombine.high %v1275_v5, %v1279_v6  ;;  %v1282_v11 = vld [vmem:[#allocation14 + $0x7d0] sm:$0xff] }
 0x4bc   :  { %2911 = vmatprep.subr.bf16.mxu0 %v4003_v12  ;;  %v1286_v12 = vld [vmem:[#allocation14 + $0x7f0] sm:$0xff] }
 0x4be   :  { %2830 = vmatpush1.bf16.msra.mxu1 %v4000_v17  ;;  %v4065_v17 = vcombine.high %v1282_v11, %v1286_v12 }
 0x4bf   :  { %2912 = vmatpush1.bf16.msra.mxu0 %v4002_v18  ;;  %2831 = vmatprep.subr.bf16.mxu1 %v4009_v21  ;;  %v4067_v18 = vcombine.high %v1283_v13, %v1287_v14  ;;  %v4064_v21 = vcombine.low %v1282_v11, %v1286_v12 }
 0x4c0   :  { %2913 = vmatprep.subr.bf16.mxu0 %v4011_v22  ;;  %v4066_v22 = vcombine.low %v1283_v13, %v1287_v14 }
 0x4c2   :  { %2832 = vmatpush1.bf16.msra.mxu1 %v4008_v42  ;;  %v4487_v42 = vld [vmem:[#allocation15 + $0x48] sm:$0xff]  }
 0x4c3   :  { %2914 = vmatpush1.bf16.msra.mxu0 %v4010_v29  ;;  %2833 = vmatprep.subr.bf16.mxu1 %v4017_v30  ;;  %v4488_v29 = vld [vmem:[#allocation15 + $0xc8] sm:$0xff]  }
 0x4c4   :  { %2915 = vmatprep.subr.bf16.mxu0 %v4019_v31  ;;  %v4489_v30 = vld [vmem:[#allocation15 + $0x8] sm:$0xff]  }
 0x4c5   :  { %v4490_v31 = vld [vmem:[#allocation15 + $0x88] sm:$0xff]  }
 0x4c6   :  { %2834 = vmatpush1.bf16.msra.mxu1 %v4016_v36  ;;  %v4495_v36 = vld [vmem:[#allocation15 + $0x58] sm:$0xff]  }
 0x4c7   :  { %2916 = vmatpush1.bf16.msra.mxu0 %v4018_v37  ;;  %2835 = vmatprep.subr.bf16.mxu1 %v4025_v38  ;;  %v4496_v37 = vld [vmem:[#allocation15 + $0xd8] sm:$0xff]  }
 0x4c8   :  { %2917 = vmatprep.subr.bf16.mxu0 %v4027_v43  ;;  %v4497_v38 = vld [vmem:[#allocation15 + $0x18] sm:$0xff]   ;;  %v4499_v43 = vld [vmem:[#allocation15 + $0x60] sm:$0xff]  }
 0x4ca   :  { %2836 = vmatpush1.bf16.msra.mxu1 %v4024_v45  ;;  %v4504_v45 = vld [vmem:[#allocation15 + $0xe8] sm:$0xff]  }
 0x4cb   :  { %2918 = vmatpush1.bf16.msra.mxu0 %v4026_v46  ;;  %2837 = vmatprep.subr.bf16.mxu1 %v4033_v50  ;;  %v4505_v46 = vld [vmem:[#allocation15 + $0x28] sm:$0xff]  }
 0x4cc   :  { %2919 = vmatprep.subr.bf16.mxu0 %v4035_v47  ;;  %v4506_v50 = vld [vmem:[#allocation15 + $0xa8] sm:$0xff]   ;;  %v4507_v47 = vld [vmem:[#allocation15 + $0x70] sm:$0xff]  }
 0x4ce   :  { %2838 = vmatpush1.bf16.msra.mxu1 %v4032_v19  ;;  %v4512_v19 = vld [vmem:[#allocation15 + $0xf8] sm:$0xff]  }
 0x4cf   :  { %2920 = vmatpush1.bf16.msra.mxu0 %v4034_v53  ;;  %2839 = vmatprep.subr.bf16.mxu1 %v4041_v54  ;;  %v4513_v53 = vld [vmem:[#allocation15 + $0x38] sm:$0xff]  }
 0x4d0   :  { %2921 = vmatprep.subr.bf16.mxu0 %v4043_v55  ;;  %v4514_v54 = vld [vmem:[#allocation15 + $0xb8] sm:$0xff]   ;;  %v4515_v55 = vld [vmem:[#allocation15 + $0x140] sm:$0xff]  }
 0x4d2   :  { %2840 = vmatpush1.bf16.msra.mxu1 %v4040_v60  ;;  %v1297_v60 = vrot.slane %v5017_v57, %v4966_v0 }
 0x4d3   :  { %2922 = vmatpush1.bf16.msra.mxu0 %v4042_v63  ;;  %2841 = vmatprep.subr.bf16.mxu1 %v4049_v25  ;;  %v1305_v63 = vrot.slane %v5017_v57, %v616_v20  ;;  %v4518_v20 = vld [vmem:[#allocation15 + $0x180] sm:$0xff]  }
 0x4d4   :  { %2923 = vmatprep.subr.bf16.mxu0 %v4051_v1 }
 0x4d6   :  { %2842 = vmatpush1.bf16.msra.mxu1 %v4048_v7 }
 0x4d7   :  { %2924 = vmatpush1.bf16.msra.mxu0 %v4050_v8  ;;  %2843 = vmatprep.subr.bf16.mxu1 %v4057_v9 }
 0x4d8   :  { %2925 = vmatprep.subr.bf16.mxu0 %v4059_v10 }
 0x4da   :  { %2844 = vmatpush1.bf16.msra.mxu1 %v4056_v15 }
 0x4db   :  { %2926 = vmatpush1.bf16.msra.mxu0 %v4058_v16  ;;  %2845 = vmatprep.subr.bf16.mxu1 %v4065_v17  ;;  %v4517_v16 = vld [vmem:[#allocation15 + $0x100] sm:$0xff]  }
 0x4dc   :  { %2927 = vmatprep.subr.bf16.mxu0 %v4067_v18 }
 0x4de   :  { %2846 = vmatpush1.bf16.msra.mxu1 %v4064_v21  ;;  %v4519_v21 = vld [vmem:[#allocation15 + $0x148] sm:$0xff]  }
 0x4df   :  { %2928 = vmatpush1.bf16.msra.mxu0 %v4066_v22  ;;  %4175 = vmatprep.subr.bf16.mxu1 %v4483_v23  ;;  %v4520_v22 = vld [vmem:[#allocation15 + $0x1c8] sm:$0xff]  }
 0x4e0   :  { %4197 = vmatprep.subr.bf16.mxu0 %v4484_v24  ;;  %v4521_v23 = vld [vmem:[#allocation15 + $0x108] sm:$0xff]  }
 0x4e1   :  { %2848 = vmatmul.mubr.bf16.vlgmr.msra.gmra.mrb[12].mxu1 %v5002_v3  ;;  %v4522_v24 = vld [vmem:[#allocation15 + $0x188] sm:$0xff]  }
 0x4e2   :  { %2930 = vmatmul.mubr.bf16.vlgmr.msra.gmra.mrb[16].mxu0 %v5002_v3  ;;  %4176 = vmatpush3.bf16.msra.mxu1 %v4485_v26  ;;  %v4498_v3 = vld [vmem:[#allocation15 + $0x98] sm:$0xff]   ;;  %v4523_v26 = vld [vmem:[#allocation15 + $0x150] sm:$0xff]  }
 0x4e3   :  { %4198 = vmatpush3.bf16.msra.mxu0 %v4486_v27  ;;  %4177 = vmatprep.subr.bf16.mxu1 %v4487_v42  ;;  %v4524_v27 = vld [vmem:[#allocation15 + $0x1d0] sm:$0xff]  }
 0x4e4   :  { %4199 = vmatprep.subr.bf16.mxu0 %v4488_v29  ;;  %v4525_v42 = vld [vmem:[#allocation15 + $0x110] sm:$0xff]  }
 0x4e5   :  { %v4526_v29 = vld [vmem:[#allocation15 + $0x190] sm:$0xff]  }
 0x4e6   :  { %4178 = vmatpush3.bf16.msra.mxu1 %v4489_v30  ;;  %v4527_v30 = vld [vmem:[#allocation15 + $0x158] sm:$0xff]  }
 0x4e7   :  { %4200 = vmatpush3.bf16.msra.mxu0 %v4490_v31  ;;  %4179 = vmatprep.subr.bf16.mxu1 %v4491_v32  ;;  %v4528_v31 = vld [vmem:[#allocation15 + $0x1d8] sm:$0xff]  }
 0x4e8   :  { %4201 = vmatprep.subr.bf16.mxu0 %v4492_v33  ;;  %v4529_v32 = vld [vmem:[#allocation15 + $0x118] sm:$0xff]  }
 0x4e9   :  { %v4530_v33 = vld [vmem:[#allocation15 + $0x198] sm:$0xff]  }
 0x4ea   :  { %4180 = vmatpush3.bf16.msra.mxu1 %v4493_v34  ;;  %v4531_v34 = vld [vmem:[#allocation15 + $0x160] sm:$0xff]  }
 0x4eb   :  { %4202 = vmatpush3.bf16.msra.mxu0 %v4494_v35  ;;  %4181 = vmatprep.subr.bf16.mxu1 %v4495_v36  ;;  %v4532_v35 = vld [vmem:[#allocation15 + $0x1e0] sm:$0xff]  }
 0x4ec   :  { %4203 = vmatprep.subr.bf16.mxu0 %v4496_v37  ;;  %v4533_v36 = vld [vmem:[#allocation15 + $0x120] sm:$0xff]  }
 0x4ed   :  { %v4534_v37 = vld [vmem:[#allocation15 + $0x1a0] sm:$0xff]  }
 0x4ee   :  { %4182 = vmatpush3.bf16.msra.mxu1 %v4497_v38  ;;  %v4535_v38 = vld [vmem:[#allocation15 + $0x168] sm:$0xff]  }
 0x4ef   :  { %4204 = vmatpush3.bf16.msra.mxu0 %v4498_v3  ;;  %4183 = vmatprep.subr.bf16.mxu1 %v4499_v43  ;;  %v4536_v3 = vld [vmem:[#allocation15 + $0x1e8] sm:$0xff]  }
 0x4f0   :  { %4205 = vmatprep.subr.bf16.mxu0 %v4500_v39  ;;  %v4537_v43 = vld [vmem:[#allocation15 + $0x128] sm:$0xff]  }
 0x4f1   :  { %v4538_v39 = vld [vmem:[#allocation15 + $0x1a8] sm:$0xff]  }
 0x4f2   :  { %4184 = vmatpush3.bf16.msra.mxu1 %v4501_v40  ;;  %v4539_v40 = vld [vmem:[#allocation15 + $0x170] sm:$0xff]  }
 0x4f3   :  { %4206 = vmatpush3.bf16.msra.mxu0 %v4502_v41  ;;  %4185 = vmatprep.subr.bf16.mxu1 %v4503_v44  ;;  %v4540_v41 = vld [vmem:[#allocation15 + $0x1f0] sm:$0xff]  }
 0x4f4   :  { %4207 = vmatprep.subr.bf16.mxu0 %v4504_v45  ;;  %v4541_v44 = vld [vmem:[#allocation15 + $0x130] sm:$0xff]  }
 0x4f5   :  { %v4542_v45 = vld [vmem:[#allocation15 + $0x1b0] sm:$0xff]  }
 0x4f6   :  { %4186 = vmatpush3.bf16.msra.mxu1 %v4505_v46  ;;  %v4543_v46 = vld [vmem:[#allocation15 + $0x178] sm:$0xff]  }
 0x4f7   :  { %4208 = vmatpush3.bf16.msra.mxu0 %v4506_v50  ;;  %4187 = vmatprep.subr.bf16.mxu1 %v4507_v47  ;;  %v4544_v50 = vld [vmem:[#allocation15 + $0x1f8] sm:$0xff]  }
 0x4f8   :  { %4209 = vmatprep.subr.bf16.mxu0 %v4508_v48  ;;  %v4545_v47 = vld [vmem:[#allocation15 + $0x138] sm:$0xff]  }
 0x4f9   :  { %v4546_v48 = vld [vmem:[#allocation15 + $0x1b8] sm:$0xff]  }
 0x4fa   :  { %4188 = vmatpush3.bf16.msra.mxu1 %v4509_v49  ;;  %v1308_v49 = vsub.s32 4, %v4957_v61 }
 0x4fb   :  { %4210 = vmatpush3.bf16.msra.mxu0 %v4510_v51  ;;  %4189 = vmatprep.subr.bf16.mxu1 %v4511_v52  ;;  %v1316_v51 = vsub.s32 6, %v4957_v61  ;;  %v1312_v52 = vsub.s32 5, %v4957_v61 }
 0x4fc   :  { %4211 = vmatprep.subr.bf16.mxu0 %v4512_v19  ;;  %v1320_v19 = vsub.s32 7, %v4957_v61 }
 0x4fe   :  { %4190 = vmatpush3.bf16.msra.mxu1 %v4513_v53  ;;  %v1309_v53 = vrot.slane %v5017_v57, %v1308_v49 }
 0x4ff   :  { %4212 = vmatpush3.bf16.msra.mxu0 %v4514_v54  ;;  %4219 = vmatprep.subr.bf16.mxu1 %v4515_v55  ;;  %v1317_v54 = vrot.slane %v5017_v57, %v1316_v51  ;;  %v1313_v55 = vrot.slane %v5017_v57, %v1312_v52 }
 0x500   :  { %4241 = vmatprep.subr.bf16.mxu0 %v4516_v56  ;;  %v1321_v56 = vrot.slane %v5017_v57, %v1320_v19 }
 0x534   :  { %v2685_v25 = vpop.f32.mrb[8].mxu1  ;;  %v2767_v1 = vpop.f32.mrb[12].mxu0 }
 0x535   :  { %v4303_v2 = vadd.f32 %v2685_v25, %v1293_v58  ;;  %v4305_v4 = vadd.f32 %v2767_v1, %v1301_v59  ;;  %v2687_v5 = vpop.f32.mrb[9].mxu1  ;;  %v2769_v6 = vpop.f32.mrb[13].mxu0 }
 0x536   :  { %v4304_v7 = vadd.f32 %v2687_v5, %v1297_v60  ;;  %v4306_v8 = vadd.f32 %v2769_v6, %v1305_v63  ;;  %v2689_v62 = vpop.f32.mrb[10].mxu1  ;;  %v2771_v9 = vpop.f32.mrb[14].mxu0 }
 0x537   :  { %v2938_v10 = vmax.f32 %v4303_v2, 0.0  ;;  %v2940_v11 = vmax.f32 %v4305_v4, 0.0  ;;  %v2690_v28 = vpop.f32.mrb[11].mxu1  ;;  %v2772_v12 = vpop.f32.mrb[15].mxu0 }
 0x538   :  { %v2939_v13 = vmax.f32 %v4304_v7, 0.0  ;;  %v2941_v0 = vmax.f32 %v4306_v8, 0.0 }
 0x539   :  { %v4149_v17 = vpack.c.bf16 %v2938_v10, %v2938_v10  ;;  %v4151_v18 = vpack.c.bf16 %v2940_v11, %v2940_v11 }
 0x53a   :  { %v4150_v14 = vpack.c.bf16 %v2939_v13, %v2939_v13  ;;  %v4152_v15 = vpack.c.bf16 %v2941_v0, %v2941_v0 }
 0x53c   :  { %3565 = vmatprep.mubr.bf16.mxu1 %v4150_v14  ;;  %3605 = vmatprep.mubr.bf16.mxu0 %v4152_v15  ;;  %v4072_v14 = vld [vmem:[%s5064_s12] ss:$0 sm:$0xff]  ;;  %s4778_s12 = smov [#allocation17]  }
 0x53d   :  { %3566 = vmatmul.mubr.bf16.vlgmr.msra.gmra.mrb[16].mxu1 %v4149_v17  ;;  %3606 = vmatmul.mubr.bf16.vlgmr.msra.gmra.mrb[20].mxu0 %v4151_v18  ;;  %s3701_s28 = sshll.u32 %s4778_s12, 4  ;;  %s3702_s28 = int_to_ptr.vmem [resolvable:$true] %s3701_s28 }
 0x53e   :  { %4220 = vmatpush3.bf16.msra.mxu1 %v4517_v16  ;;  %4242 = vmatpush3.bf16.msra.mxu0 %v4518_v20  ;;  %s4725_s29 = scalar_lea.vmem %s3702_s28, 128  ;;  %p4730_p9 = scmp.lt.s32.totalorder %s3702_s28, %s3702_s28 }
 0x53f   :  { %4221 = vmatprep.subr.bf16.mxu1 %v4519_v21  ;;  %4243 = vmatprep.subr.bf16.mxu0 %v4520_v22  ;;  %p4726_p8 = scmp.ne.s32.totalorder %s3702_s28, %s4725_s29  ;;  %p4731_p10 = scmp.lt.s32.totalorder %s4725_s29, %s4725_s29 }
 0x541   :  { %p4732_p11 = por %p4731_p10, %p4730_p9 }
 0x542   :  { %4222 = vmatpush3.bf16.msra.mxu1 %v4521_v23  ;;  %4244 = vmatpush3.bf16.msra.mxu0 %v4522_v24 }
 0x543   :  { %4223 = vmatprep.subr.bf16.mxu1 %v4523_v26  ;;  %4245 = vmatprep.subr.bf16.mxu0 %v4524_v27  ;;  %p4733_p12 = pnand %p4732_p11, %p4726_p8 }
 0x546   :  { %4224 = vmatpush3.bf16.msra.mxu1 %v4525_v42  ;;  %4246 = vmatpush3.bf16.msra.mxu0 %v4526_v29 }
 0x547   :  { %4225 = vmatprep.subr.bf16.mxu1 %v4527_v30  ;;  %4247 = vmatprep.subr.bf16.mxu0 %v4528_v31 }
 0x54a   :  { %4226 = vmatpush3.bf16.msra.mxu1 %v4529_v32  ;;  %4248 = vmatpush3.bf16.msra.mxu0 %v4530_v33 }
 0x54b   :  { %4227 = vmatprep.subr.bf16.mxu1 %v4531_v34  ;;  %4249 = vmatprep.subr.bf16.mxu0 %v4532_v35 }
 0x54e   :  { %4228 = vmatpush3.bf16.msra.mxu1 %v4533_v36  ;;  %4250 = vmatpush3.bf16.msra.mxu0 %v4534_v37 }
 0x54f   :  { %4229 = vmatprep.subr.bf16.mxu1 %v4535_v38  ;;  %4251 = vmatprep.subr.bf16.mxu0 %v4536_v3 }
 0x552   :  { %4230 = vmatpush3.bf16.msra.mxu1 %v4537_v43  ;;  %4252 = vmatpush3.bf16.msra.mxu0 %v4538_v39 }
 0x553   :  { %4231 = vmatprep.subr.bf16.mxu1 %v4539_v40  ;;  %4253 = vmatprep.subr.bf16.mxu0 %v4540_v41 }
 0x556   :  { %4232 = vmatpush3.bf16.msra.mxu1 %v4541_v44  ;;  %4254 = vmatpush3.bf16.msra.mxu0 %v4542_v45 }
 0x557   :  { %4233 = vmatprep.subr.bf16.mxu1 %v4543_v46  ;;  %4255 = vmatprep.subr.bf16.mxu0 %v4544_v50 }
 0x55a   :  { %4234 = vmatpush3.bf16.msra.mxu1 %v4545_v47  ;;  %4256 = vmatpush3.bf16.msra.mxu0 %v4546_v48 }
 0x5b4   :  { %v2849_v58 = vpop.f32.mrb[12].mxu1 }
 0x5b5   :  { %v4307_v59 = vadd.f32 %v2849_v58, %v1309_v53  ;;  %v2931_v60 = vpop.f32.mrb[16].mxu0  ;;  %v2851_v63 = vpop.f32.mrb[13].mxu1 }
 0x5b6   :  { %v4309_v25 = vadd.f32 %v2931_v60, %v1317_v54  ;;  %v4308_v1 = vadd.f32 %v2851_v63, %v1313_v55  ;;  %v2933_v2 = vpop.f32.mrb[17].mxu0  ;;  %v2853_v4 = vpop.f32.mrb[14].mxu1 }
 0x5b7   :  { %v2942_v5 = vmax.f32 %v4307_v59, 0.0  ;;  %v4310_v6 = vadd.f32 %v2933_v2, %v1321_v56  ;;  %v2935_v7 = vpop.f32.mrb[18].mxu0  ;;  %v2854_v61 = vpop.f32.mrb[15].mxu1 }
 0x5b8   :  { %v2944_v8 = vmax.f32 %v4309_v25, 0.0  ;;  %v2943_v62 = vmax.f32 %v4308_v1, 0.0  ;;  %v2936_v9 = vpop.f32.mrb[19].mxu0 }
 0x5b9   :  { %v2945_v10 = vmax.f32 %v4310_v6, 0.0  ;;  %v4153_v28 = vpack.c.bf16 %v2942_v5, %v2942_v5 }
 0x5ba   :  { %v4154_v11 = vpack.c.bf16 %v2943_v62, %v2943_v62  ;;  %v4155_v57 = vpack.c.bf16 %v2944_v8, %v2944_v8 }
 0x5bb   :  { %v4156_v12 = vpack.c.bf16 %v2945_v10, %v2945_v10 }
 0x5bc   :  { %3645 = vmatprep.mubr.bf16.mxu1 %v4154_v11 }
 0x5bd   :  { %3685 = vmatprep.mubr.bf16.mxu0 %v4156_v12  ;;  %3646 = vmatmul.mubr.bf16.vlgmr.msra.gmra.mrb[20].mxu1 %v4153_v28 }
 0x5be   :  { %3686 = vmatmul.mubr.bf16.vlgmr.msra.gmra.mrb[24].mxu0 %v4155_v57 }
 0x610   :  { %v4191_v13 = vpop.f32.mrb[16].mxu1  ;;  %v4213_v0 = vpop.f32.mrb[20].mxu0 }
 0x611   :  { %v4192_v15 = vpop.f32.mrb[17].mxu1  ;;  %v4214_v16 = vpop.f32.mrb[21].mxu0 }
 0x612   :  { %v4193_v20 = vadd.f32 %v4192_v15, %v4191_v13  ;;  %v4215_v17 = vadd.f32 %v4214_v16, %v4213_v0  ;;  %v4194_v18 = vpop.f32.mrb[18].mxu1  ;;  %v4216_v21 = vpop.f32.mrb[22].mxu0 }
 0x613   :  { %v4195_v22 = vpop.f32.mrb[19].mxu1  ;;  %v4217_v23 = vpop.f32.mrb[23].mxu0 }
 0x614   :  { %v3568_v24 = vadd.f32 %v4193_v20, %v4072_v14 }
 0x616   :  { %v3608_v26 = vadd.f32 %v4215_v17, %v3568_v24 }
 0x690   :  { %v4235_v27 = vpop.f32.mrb[20].mxu1 }
 0x691   :  { %v4257_v42 = vpop.f32.mrb[24].mxu0  ;;  %v4236_v29 = vpop.f32.mrb[21].mxu1 }
 0x692   :  { %v4237_v30 = vadd.f32 %v4236_v29, %v4235_v27  ;;  %v4258_v31 = vpop.f32.mrb[25].mxu0  ;;  %v4238_v32 = vpop.f32.mrb[22].mxu1 }
 0x693   :  { %v4259_v33 = vadd.f32 %v4258_v31, %v4257_v42  ;;  %v4260_v34 = vpop.f32.mrb[26].mxu0  ;;  %v4239_v35 = vpop.f32.mrb[23].mxu1 }
 0x694   :  { %v3648_v36 = vadd.f32 %v4237_v30, %v3608_v26  ;;  %v4261_v37 = vpop.f32.mrb[27].mxu0 }
 0x696   :  { %v3688_v38 = vadd.f32 %v4259_v33, %v3648_v36 }
 0x698   :  { %4547 = vtanh.f32 %v3688_v38 }
 0x6a2   :  { %v4548_v3 = vpop.eup %4547 }
 0x6a3   :  { %3694 = vst [vmem:[#allocation17] sm:$0xff] %v4548_v3 }
 0x6a4   :  { %4736 = shalt.err (!%p4733_p12)
}
 0x6a5   :  { %s4737_s27 = scalar_lea.hbm %s5065_s13, 128 }
 0x6a6   :  { %p4738_p13 = scmp.ne.s32.totalorder %s5065_s13, %s4737_s27  ;;  %p4741_p0 = scmp.lt.u32.totalorder %s4737_s27, %s5065_s13 }
 0x6a8   :  { %p4743_p1 = pnand %p4741_p0, %p4738_p13 }
 0x6aa   :  { %4746 = shalt.err (!%p4743_p1)
}
 0x6ab   :  { %3704 = dma.vmem_to_hbm [thread:$0]  %s3702_s28, 128, %s5065_s13, [#allocation5]  }
 0x6ac   :  { %4757 = dma.done.wait [#allocation5], 128  }
 0x6ad   :  { %4758 = vsyncadd [#allocation5], 4294967168 }
 0x6ae   :  { %3708 = vsyncpa [#allocation4], 1 }
 0x6af   :  { %3709 = vsyncpa [#allocation7], 1 }
 0x6b0   :  { %3710 = vsyncpa [#allocation10], 1 }
 0x6b1   :  { %3711 = vsyncpa [#allocation13], 1 }
 0x6b2   :  { %3712 = vsyncpa [#allocation16], 1 }
 0x6b3   :  { %3713 = vsyncpa [#allocation5], 1 }

</bundles_post_ra>
